<compile_context>
chip_gen: v5e
topology: v5e:2x2
jax: 0.10.0
libtpu: 0.0.40
codegen_flags: <defaults>
</compile_context>

<pallas_src>
import functools

import jax
import jax.numpy as jnp
from jax.experimental import pallas as pl
from jax.experimental.pallas import tpu as pltpu


# ------------------------------------------------------------------ helpers --

def _tpu_vmem_caps():
    """Generation-aware VMEM working-set budget and compiler limit (bytes)."""
    try:
        cap = int(pltpu.get_tpu_info().vmem_capacity_bytes)
    except Exception:
        cap = 128 << 20
    budget = int(cap * 0.45)                 # tile-picker working-set budget
    limit_hi = min(int(cap * 0.70), 100 << 20)
    return budget, limit_hi


def _pick_row_tile(oh, wpp, cin, cout, batch, budget):
    """Output-row tile TR (multiple of 16): VMEM-budgeted, enough grid steps."""
    def need(tr):
        tsp, halo = tr * wpp, 16 * wpp
        b = 2  # bf16 bytes
        return (2 * cin * tsp * b            # main input block, double buffered
                + 2 * cin * halo * b         # halo block, double buffered
                + 2 * cout * tsp * b         # conv output block, double buffered
                + cin * (tsp + halo) * b     # window scratch
                + 4 * tsp)                   # column mask (f32)

    tr = 16 * max(1, -(-oh // 16))           # start: all rows in one tile
    tr = min(tr, 512)
    while tr > 16 and tr * wpp > 32768:      # keep flat tiles reasonable
        tr -= 16
    while tr > 16 and need(tr) > budget:
        tr -= 16
    # keep >= 4 grid steps so both v7x TensorCores get sharded work
    while tr > 16 and batch * (-(-oh // tr)) < 4:
        tr -= 16
    return tr


def _pick_chunk(tr, wpp, target=1024):
    """Largest row-count divisor of TR with chunk width (rows*Wpp) <= target."""
    best = 1
    for d in range(1, tr + 1):
        if tr % d == 0 and d * wpp <= target:
            best = d
    return best * wpp


# ------------------------------------------------------------------ kernels --

def _make_conv_kernel(taps_off, n_chunks, chunk, tsp, cout, out_dtype):
    """Fused-im2col conv + per-tile BN partial stats."""

    def kernel(w_ref, mask_ref, a_ref, h_ref, o_ref, psum_ref, psq_ref, win_ref):
        # Stage the contiguous flat window (tile + 16-row halo) in VMEM so every
        # tap is a static lane-offset slice (nothing im2col-like touches HBM).
        for c0 in range(0, tsp, chunk):
            win_ref[:, c0:c0 + chunk] = a_ref[0, :, c0:c0 + chunk]
        win_ref[:, tsp:] = h_ref[0]

        psum = jnp.zeros((cout, 1), jnp.float32)
        psq = jnp.zeros((cout, 1), jnp.float32)
        for c in range(n_chunks):                       # strip-mined lane chunks
            c0 = c * chunk
            acc = jnp.zeros((cout, chunk), jnp.float32)
            for t, off in enumerate(taps_off):          # 16 static taps
                xs = win_ref[:, c0 + off:c0 + off + chunk]      # (Cin, chunk) bf16
                acc = acc + jnp.dot(w_ref[t], xs,
                                    preferred_element_type=jnp.float32)
            # zero the structurally-invalid (padded) columns -> neutral for BN
            accm = acc * mask_ref[:, c0:c0 + chunk]
            o_ref[0, :, c0:c0 + chunk] = accm.astype(out_dtype)
            psum = psum + jnp.sum(accm, axis=1, keepdims=True)
            psq = psq + jnp.sum(accm * accm, axis=1, keepdims=True)
        psum_ref[0] = psum
        psq_ref[0] = psq

    return kernel


def _bn_relu_crop_kernel(x_ref, scale_ref, shift_ref, o_ref, *, ow):
    # x_ref: (1, Cout, TRB, Wpp) bf16; o_ref: (1, Cout, TRB, OW) f32
    y = x_ref[0, :, :, :ow].astype(jnp.float32)
    y = y * scale_ref[...] + shift_ref[...]
    o_ref[0] = jnp.maximum(y, 0.0)


# ------------------------------------------------------------------ forward --

def rot_deconv2d_forward(x, weight, gamma, beta, N, *, eps=1e-5):
    """x: (B, Cin, H, W) NCHW; weight: (Cout, Cin, 4, 4); gamma/beta: (Cout//N,)."""
    B, Cin, H, W = x.shape
    Cout = weight.shape[0]
    assert weight.shape == (Cout, Cin, 4, 4) and Cout % N == 0

    OH, OW = 2 * H, 2 * W
    Wpp = 8 * (-(-(2 * W + 3) // 8))          # padded checkerboard width (mult of 8)

    budget, vmem_hi = _tpu_vmem_caps()
    TR = _pick_row_tile(OH, Wpp, Cin, Cout, B, budget)   # output rows per tile
    OHp = TR * (-(-OH // TR))
    n_t = OHp // TR
    TSP = TR * Wpp                            # flat tile width   (multiple of 128)
    HALO = 16 * Wpp                           # 16-row halo block (multiple of 128)
    CHUNK = _pick_chunk(TR, Wpp)
    n_chunks = TSP // CHUNK
    Hp_alloc = OHp + 16                       # extra zero rows cover last halo

    # --- checkerboard "pad" (rot_deconv2d.pad), scattered straight into the
    #     zero-extended buffer the conv kernel tiles over (no extra XLA pass) ---
    xb = x.astype(jnp.bfloat16)
    xp = jnp.zeros((B, Cin, Hp_alloc, Wpp), jnp.bfloat16)
    xp = xp.at[:, :, 0:2 * H:2, 0:2 * W:2].set(xb)
    xp = xp.at[:, :, 1:2 * H:2, 1:2 * W:2].set(xb)
    xpf = xp.reshape(B, Cin, Hp_alloc * Wpp)  # free (contiguous) reshape

    # weight -> (16, Cout, Cin) tap-major bf16 (MXU operands), f32 accumulation
    # TODO(synk): R2Conv's equivariant steerable-basis weight expansion is not
    # reproduced; the (Cout, Cin, 4, 4) weight is treated as a free parameter.
    w_taps = jnp.transpose(weight, (2, 3, 0, 1)).reshape(16, Cout, Cin)
    w_taps = w_taps.astype(jnp.bfloat16)

    taps_off = [ki * Wpp + kj for ki in range(4) for kj in range(4)]
    colmask = (jnp.arange(TSP, dtype=jnp.int32) % Wpp) < OW
    colmask = colmask.astype(jnp.float32).reshape(1, TSP)

    flops = int(2 * B * OHp * Wpp * 16 * Cin * Cout)
    bytes_accessed = int(2 * B * Cin * Hp_alloc * Wpp * (1.0 + 16.0 / TR)
                         + 2 * B * Cout * OHp * Wpp
                         + 2 * 16 * Cout * Cin + 4 * TSP + 8 * B * n_t * Cout)
    vmem_need = (4 * Cin * TSP + 4 * Cin * HALO + 4 * Cout * TSP
                 + 2 * Cin * (TSP + HALO) + 4 * TSP + 4 * 16 * Cout * Cin
                 + (2 << 20))
    vmem_limit = int(min(max(vmem_need, 16 << 20), vmem_hi))

    conv_kernel = _make_conv_kernel(taps_off, n_chunks, CHUNK, TSP, Cout,
                                    jnp.bfloat16)
    conv_out, psum, psq = pl.pallas_call(
        conv_kernel,
        out_shape=(jax.ShapeDtypeStruct((B, Cout, OHp * Wpp), jnp.bfloat16),
                   jax.ShapeDtypeStruct((B * n_t, Cout, 1), jnp.float32),
                   jax.ShapeDtypeStruct((B * n_t, Cout, 1), jnp.float32)),
        grid_spec=pltpu.PrefetchScalarGridSpec(
            num_scalar_prefetch=0,
            grid=(B, n_t),
            in_specs=[
                pl.BlockSpec((16, Cout, Cin), lambda b, s: (0, 0, 0)),   # resident
                pl.BlockSpec((1, TSP), lambda b, s: (0, 0)),             # resident
                pl.BlockSpec((1, Cin, TSP), lambda b, s: (b, 0, s)),     # row band
                pl.BlockSpec((1, Cin, HALO),                             # 16-row halo
                             lambda b, s: (b, 0, (s + 1) * (TR // 16))),
            ],
            out_specs=(
                pl.BlockSpec((1, Cout, TSP), lambda b, s: (b, 0, s)),
                pl.BlockSpec((1, Cout, 1), lambda b, s: (b * n_t + s, 0, 0)),
                pl.BlockSpec((1, Cout, 1), lambda b, s: (b * n_t + s, 0, 0)),
            ),
            scratch_shapes=[pltpu.VMEM((Cin, TSP + HALO), jnp.bfloat16)]),
        compiler_params=pltpu.CompilerParams(
            dimension_semantics=("parallel", "parallel"),
            vmem_limit_bytes=vmem_limit),
        cost_estimate=pl.CostEstimate(flops=flops, transcendentals=0,
                                      bytes_accessed=bytes_accessed),
    )(w_taps, colmask, xpf, xpf)

    # InnerBatchNorm: one field = N consecutive output channels; training-mode
    # batch stats over (batch, orientation, spatial). Padded rows are exact
    # zeros and padded columns are masked, so count uses only valid positions.
    # TODO(synk): single-pass E[x^2]-E[x]^2 (clamped >=0) in f32; switch to a
    # two-pass / Welford reduction if bit-accurate parity with PyTorch matters.
    n_fields = Cout // N
    count = float(B * OH * OW * N)
    csum = jnp.sum(psum[:, :, 0], axis=0)               # (Cout,)
    csq = jnp.sum(psq[:, :, 0], axis=0)                 # (Cout,)
    fsum = csum.reshape(n_fields, N).sum(axis=1)
    fsq = csq.reshape(n_fields, N).sum(axis=1)
    mean = fsum / count
    var = jnp.maximum(fsq / count - mean * mean, 0.0)
    inv = gamma.astype(jnp.float32) / jnp.sqrt(var + eps)
    scale = jnp.repeat(inv, N).reshape(Cout, 1, 1)
    shift = jnp.repeat(beta.astype(jnp.float32) - mean * inv, N).reshape(Cout, 1, 1)

    # BN + ReLU + crop, writing the final unpadded NCHW output directly.
    conv4d = conv_out.reshape(B, Cout, OHp, Wpp)        # free reshape
    TRB = 8
    n_bn = -(-OH // TRB)
    out = pl.pallas_call(
        functools.partial(_bn_relu_crop_kernel, ow=OW),
        out_shape=jax.ShapeDtypeStruct((B, Cout, OH, OW), jnp.float32),
        grid_spec=pltpu.PrefetchScalarGridSpec(
            num_scalar_prefetch=0,
            grid=(B, n_bn),
            in_specs=[pl.BlockSpec((1, Cout, TRB, Wpp), lambda b, t: (b, 0, t, 0)),
                      pl.BlockSpec((Cout, 1, 1), lambda b, t: (0, 0, 0)),
                      pl.BlockSpec((Cout, 1, 1), lambda b, t: (0, 0, 0))],
            out_specs=pl.BlockSpec((1, Cout, TRB, OW), lambda b, t: (b, 0, t, 0))),
        compiler_params=pltpu.CompilerParams(
            dimension_semantics=("parallel", "parallel"),
            vmem_limit_bytes=vmem_limit),
    )(conv4d, scale, shift)
    return out


if __name__ == "__main__":
    key = jax.random.PRNGKey(0)
    N = 4                       # rotation group order
    input_channels = 4          # fields in  -> Cin  = 16 channels
    output_channels = 4         # fields out -> Cout = 16 channels
    B, H, W = 2, 16, 16
    Cin, Cout = input_channels * N, output_channels * N

    k1, k2, k3, k4 = jax.random.split(key, 4)
    x = jax.random.normal(k1, (B, Cin, H, W), jnp.float32)
    weight = 0.1 * jax.random.normal(k2, (Cout, Cin, 4, 4), jnp.float32)
    gamma = 1.0 + 0.1 * jax.random.normal(k3, (output_channels,), jnp.float32)
    beta = 0.1 * jax.random.normal(k4, (output_channels,), jnp.float32)

    fwd = jax.jit(rot_deconv2d_forward, static_argnums=(4,))
    out = fwd(x, weight, gamma, beta, N)
    jax.block_until_ready(out)
    assert out.shape == (B, Cout, 2 * H, 2 * W)
    assert out.dtype == jnp.float32
    print("KERNEL_OK")
</pallas_src>

<mosaic_0001>
module attributes {stable_mosaic.version = 11 : i64} {
  func.func @kernel(%arg0: i32, %arg1: i32, %arg2: memref<16x16x16xbf16, #tpu.memory_space<vmem>>, %arg3: memref<1x640xf32, #tpu.memory_space<vmem>>, %arg4: memref<1x16x640xbf16, #tpu.memory_space<vmem>>, %arg5: memref<1x16x640xbf16, #tpu.memory_space<vmem>>, %arg6: memref<1x16x640xbf16, #tpu.memory_space<vmem>>, %arg7: memref<1x16x1xf32, #tpu.memory_space<vmem>>, %arg8: memref<1x16x1xf32, #tpu.memory_space<vmem>>, %arg9: memref<16x1280xbf16, #tpu.memory_space<vmem>>) attributes {dimension_semantics = [#tpu.dimension_semantics<parallel>, #tpu.dimension_semantics<parallel>], iteration_bounds = array<i64: 2, 2>, scalar_prefetch = 0 : i64, scratch_operands = 1 : i64, tpu.core_type = #tpu.core_type<tc>, window_params = [{pipeline_mode = #tpu.pipeline_mode<synchronous>, transform_indices = @transform_0, window_bounds = array<i64: 16, 16, 16>}, {pipeline_mode = #tpu.pipeline_mode<synchronous>, transform_indices = @transform_1, window_bounds = array<i64: 1, 640>}, {transform_indices = @transform_2, window_bounds = array<i64: 1, 16, 640>}, {transform_indices = @transform_3, window_bounds = array<i64: 1, 16, 640>}, {transform_indices = @transform_4, window_bounds = array<i64: 1, 16, 640>}, {transform_indices = @transform_5, window_bounds = array<i64: 1, 16, 1>}, {transform_indices = @transform_6, window_bounds = array<i64: 1, 16, 1>}]} {
    %c0 = arith.constant 0 : index
    %c0_0 = arith.constant 0 : index
    %c0_1 = arith.constant 0 : index
    %0 = vector.load %arg4[%c0, %c0_0, %c0_1] : memref<1x16x640xbf16, #tpu.memory_space<vmem>>, vector<1x16x640xbf16>
    %1 = vector.shape_cast %0 : vector<1x16x640xbf16> to vector<16x640xbf16>
    %c0_2 = arith.constant 0 : index
    %c0_3 = arith.constant 0 : index
    %2 = vector.load %arg9[%c0_2, %c0_3] : memref<16x1280xbf16, #tpu.memory_space<vmem>>, vector<16x640xbf16>
    tpu.vector_store %arg9[%c0_2, %c0_3], %1 {strides = array<i32>} : memref<16x1280xbf16, #tpu.memory_space<vmem>>, vector<16x640xbf16>,
    %c0_4 = arith.constant 0 : index
    %c0_5 = arith.constant 0 : index
    %c0_6 = arith.constant 0 : index
    %3 = vector.load %arg5[%c0_4, %c0_5, %c0_6] : memref<1x16x640xbf16, #tpu.memory_space<vmem>>, vector<1x16x640xbf16>
    %4 = vector.shape_cast %3 : vector<1x16x640xbf16> to vector<16x640xbf16>
    %c0_7 = arith.constant 0 : index
    %c640 = arith.constant 640 : index
    %5 = vector.load %arg9[%c0_7, %c640] : memref<16x1280xbf16, #tpu.memory_space<vmem>>, vector<16x640xbf16>
    tpu.vector_store %arg9[%c0_7, %c640], %4 {strides = array<i32>} : memref<16x1280xbf16, #tpu.memory_space<vmem>>, vector<16x640xbf16>,
    %cst = arith.constant 0.000000e+00 : f32
    %6 = vector.broadcast %cst : f32 to vector<16x1xf32>
    %cst_8 = arith.constant 0.000000e+00 : f32
    %7 = vector.broadcast %cst_8 : f32 to vector<16x1xf32>
    %cst_9 = arith.constant 0.000000e+00 : f32
    %8 = vector.broadcast %cst_9 : f32 to vector<16x640xf32>
    %c0_10 = arith.constant 0 : index
    %c0_11 = arith.constant 0 : index
    %9 = vector.load %arg9[%c0_10, %c0_11] : memref<16x1280xbf16, #tpu.memory_space<vmem>>, vector<16x640xbf16>
    %c0_12 = arith.constant 0 : index
    %c0_13 = arith.constant 0 : index
    %c0_14 = arith.constant 0 : index
    %10 = vector.load %arg2[%c0_12, %c0_13, %c0_14] : memref<16x16x16xbf16, #tpu.memory_space<vmem>>, vector<1x16x16xbf16>
    %11 = vector.shape_cast %10 : vector<1x16x16xbf16> to vector<16x16xbf16>
    %cst_15 = arith.constant dense<0.000000e+00> : vector<16x640xf32>
    %12 = tpu.matmul %11, %9, %cst_15 {dimension_numbers = #tpu.dot_dimension_numbers<[1], [0], [0], [1], [0, 0, 1, 1], [], []>} : vector<16x16xbf16>, vector<16x640xbf16>, vector<16x640xf32> -> vector<16x640xf32>
    %13 = arith.addf %8, %12 : vector<16x640xf32>
    %c0_16 = arith.constant 0 : index
    %c1 = arith.constant 1 : index
    %14 = vector.load %arg9[%c0_16, %c1] : memref<16x1280xbf16, #tpu.memory_space<vmem>>, vector<16x640xbf16>
    %c1_17 = arith.constant 1 : index
    %c0_18 = arith.constant 0 : index
    %c0_19 = arith.constant 0 : index
    %15 = vector.load %arg2[%c1_17, %c0_18, %c0_19] : memref<16x16x16xbf16, #tpu.memory_space<vmem>>, vector<1x16x16xbf16>
    %16 = vector.shape_cast %15 : vector<1x16x16xbf16> to vector<16x16xbf16>
    %cst_20 = arith.constant dense<0.000000e+00> : vector<16x640xf32>
    %17 = tpu.matmul %16, %14, %cst_20 {dimension_numbers = #tpu.dot_dimension_numbers<[1], [0], [0], [1], [0, 0, 1, 1], [], []>} : vector<16x16xbf16>, vector<16x640xbf16>, vector<16x640xf32> -> vector<16x640xf32>
    %18 = arith.addf %13, %17 : vector<16x640xf32>
    %c0_21 = arith.constant 0 : index
    %c2 = arith.constant 2 : index
    %19 = vector.load %arg9[%c0_21, %c2] : memref<16x1280xbf16, #tpu.memory_space<vmem>>, vector<16x640xbf16>
    %c2_22 = arith.constant 2 : index
    %c0_23 = arith.constant 0 : index
    %c0_24 = arith.constant 0 : index
    %20 = vector.load %arg2[%c2_22, %c0_23, %c0_24] : memref<16x16x16xbf16, #tpu.memory_space<vmem>>, vector<1x16x16xbf16>
    %21 = vector.shape_cast %20 : vector<1x16x16xbf16> to vector<16x16xbf16>
    %cst_25 = arith.constant dense<0.000000e+00> : vector<16x640xf32>
    %22 = tpu.matmul %21, %19, %cst_25 {dimension_numbers = #tpu.dot_dimension_numbers<[1], [0], [0], [1], [0, 0, 1, 1], [], []>} : vector<16x16xbf16>, vector<16x640xbf16>, vector<16x640xf32> -> vector<16x640xf32>
    %23 = arith.addf %18, %22 : vector<16x640xf32>
    %c0_26 = arith.constant 0 : index
    %c3 = arith.constant 3 : index
    %24 = vector.load %arg9[%c0_26, %c3] : memref<16x1280xbf16, #tpu.memory_space<vmem>>, vector<16x640xbf16>
    %c3_27 = arith.constant 3 : index
    %c0_28 = arith.constant 0 : index
    %c0_29 = arith.constant 0 : index
    %25 = vector.load %arg2[%c3_27, %c0_28, %c0_29] : memref<16x16x16xbf16, #tpu.memory_space<vmem>>, vector<1x16x16xbf16>
    %26 = vector.shape_cast %25 : vector<1x16x16xbf16> to vector<16x16xbf16>
    %cst_30 = arith.constant dense<0.000000e+00> : vector<16x640xf32>
    %27 = tpu.matmul %26, %24, %cst_30 {dimension_numbers = #tpu.dot_dimension_numbers<[1], [0], [0], [1], [0, 0, 1, 1], [], []>} : vector<16x16xbf16>, vector<16x640xbf16>, vector<16x640xf32> -> vector<16x640xf32>
    %28 = arith.addf %23, %27 : vector<16x640xf32>
    %c0_31 = arith.constant 0 : index
    %c40 = arith.constant 40 : index
    %29 = vector.load %arg9[%c0_31, %c40] : memref<16x1280xbf16, #tpu.memory_space<vmem>>, vector<16x640xbf16>
    %c4 = arith.constant 4 : index
    %c0_32 = arith.constant 0 : index
    %c0_33 = arith.constant 0 : index
    %30 = vector.load %arg2[%c4, %c0_32, %c0_33] : memref<16x16x16xbf16, #tpu.memory_space<vmem>>, vector<1x16x16xbf16>
    %31 = vector.shape_cast %30 : vector<1x16x16xbf16> to vector<16x16xbf16>
    %cst_34 = arith.constant dense<0.000000e+00> : vector<16x640xf32>
    %32 = tpu.matmul %31, %29, %cst_34 {dimension_numbers = #tpu.dot_dimension_numbers<[1], [0], [0], [1], [0, 0, 1, 1], [], []>} : vector<16x16xbf16>, vector<16x640xbf16>, vector<16x640xf32> -> vector<16x640xf32>
    %33 = arith.addf %28, %32 : vector<16x640xf32>
    %c0_35 = arith.constant 0 : index
    %c41 = arith.constant 41 : index
    %34 = vector.load %arg9[%c0_35, %c41] : memref<16x1280xbf16, #tpu.memory_space<vmem>>, vector<16x640xbf16>
    %c5 = arith.constant 5 : index
    %c0_36 = arith.constant 0 : index
    %c0_37 = arith.constant 0 : index
    %35 = vector.load %arg2[%c5, %c0_36, %c0_37] : memref<16x16x16xbf16, #tpu.memory_space<vmem>>, vector<1x16x16xbf16>
    %36 = vector.shape_cast %35 : vector<1x16x16xbf16> to vector<16x16xbf16>
    %cst_38 = arith.constant dense<0.000000e+00> : vector<16x640xf32>
    %37 = tpu.matmul %36, %34, %cst_38 {dimension_numbers = #tpu.dot_dimension_numbers<[1], [0], [0], [1], [0, 0, 1, 1], [], []>} : vector<16x16xbf16>, vector<16x640xbf16>, vector<16x640xf32> -> vector<16x640xf32>
    %38 = arith.addf %33, %37 : vector<16x640xf32>
    %c0_39 = arith.constant 0 : index
    %c42 = arith.constant 42 : index
    %39 = vector.load %arg9[%c0_39, %c42] : memref<16x1280xbf16, #tpu.memory_space<vmem>>, vector<16x640xbf16>
    %c6 = arith.constant 6 : index
    %c0_40 = arith.constant 0 : index
    %c0_41 = arith.constant 0 : index
    %40 = vector.load %arg2[%c6, %c0_40, %c0_41] : memref<16x16x16xbf16, #tpu.memory_space<vmem>>, vector<1x16x16xbf16>
    %41 = vector.shape_cast %40 : vector<1x16x16xbf16> to vector<16x16xbf16>
    %cst_42 = arith.constant dense<0.000000e+00> : vector<16x640xf32>
    %42 = tpu.matmul %41, %39, %cst_42 {dimension_numbers = #tpu.dot_dimension_numbers<[1], [0], [0], [1], [0, 0, 1, 1], [], []>} : vector<16x16xbf16>, vector<16x640xbf16>, vector<16x640xf32> -> vector<16x640xf32>
    %43 = arith.addf %38, %42 : vector<16x640xf32>
    %c0_43 = arith.constant 0 : index
    %c43 = arith.constant 43 : index
    %44 = vector.load %arg9[%c0_43, %c43] : memref<16x1280xbf16, #tpu.memory_space<vmem>>, vector<16x640xbf16>
    %c7 = arith.constant 7 : index
    %c0_44 = arith.constant 0 : index
    %c0_45 = arith.constant 0 : index
    %45 = vector.load %arg2[%c7, %c0_44, %c0_45] : memref<16x16x16xbf16, #tpu.memory_space<vmem>>, vector<1x16x16xbf16>
    %46 = vector.shape_cast %45 : vector<1x16x16xbf16> to vector<16x16xbf16>
    %cst_46 = arith.constant dense<0.000000e+00> : vector<16x640xf32>
    %47 = tpu.matmul %46, %44, %cst_46 {dimension_numbers = #tpu.dot_dimension_numbers<[1], [0], [0], [1], [0, 0, 1, 1], [], []>} : vector<16x16xbf16>, vector<16x640xbf16>, vector<16x640xf32> -> vector<16x640xf32>
    %48 = arith.addf %43, %47 : vector<16x640xf32>
    %c0_47 = arith.constant 0 : index
    %c80 = arith.constant 80 : index
    %49 = vector.load %arg9[%c0_47, %c80] : memref<16x1280xbf16, #tpu.memory_space<vmem>>, vector<16x640xbf16>
    %c8 = arith.constant 8 : index
    %c0_48 = arith.constant 0 : index
    %c0_49 = arith.constant 0 : index
    %50 = vector.load %arg2[%c8, %c0_48, %c0_49] : memref<16x16x16xbf16, #tpu.memory_space<vmem>>, vector<1x16x16xbf16>
    %51 = vector.shape_cast %50 : vector<1x16x16xbf16> to vector<16x16xbf16>
    %cst_50 = arith.constant dense<0.000000e+00> : vector<16x640xf32>
    %52 = tpu.matmul %51, %49, %cst_50 {dimension_numbers = #tpu.dot_dimension_numbers<[1], [0], [0], [1], [0, 0, 1, 1], [], []>} : vector<16x16xbf16>, vector<16x640xbf16>, vector<16x640xf32> -> vector<16x640xf32>
    %53 = arith.addf %48, %52 : vector<16x640xf32>
    %c0_51 = arith.constant 0 : index
    %c81 = arith.constant 81 : index
    %54 = vector.load %arg9[%c0_51, %c81] : memref<16x1280xbf16, #tpu.memory_space<vmem>>, vector<16x640xbf16>
    %c9 = arith.constant 9 : index
    %c0_52 = arith.constant 0 : index
    %c0_53 = arith.constant 0 : index
    %55 = vector.load %arg2[%c9, %c0_52, %c0_53] : memref<16x16x16xbf16, #tpu.memory_space<vmem>>, vector<1x16x16xbf16>
    %56 = vector.shape_cast %55 : vector<1x16x16xbf16> to vector<16x16xbf16>
    %cst_54 = arith.constant dense<0.000000e+00> : vector<16x640xf32>
    %57 = tpu.matmul %56, %54, %cst_54 {dimension_numbers = #tpu.dot_dimension_numbers<[1], [0], [0], [1], [0, 0, 1, 1], [], []>} : vector<16x16xbf16>, vector<16x640xbf16>, vector<16x640xf32> -> vector<16x640xf32>
    %58 = arith.addf %53, %57 : vector<16x640xf32>
    %c0_55 = arith.constant 0 : index
    %c82 = arith.constant 82 : index
    %59 = vector.load %arg9[%c0_55, %c82] : memref<16x1280xbf16, #tpu.memory_space<vmem>>, vector<16x640xbf16>
    %c10 = arith.constant 10 : index
    %c0_56 = arith.constant 0 : index
    %c0_57 = arith.constant 0 : index
    %60 = vector.load %arg2[%c10, %c0_56, %c0_57] : memref<16x16x16xbf16, #tpu.memory_space<vmem>>, vector<1x16x16xbf16>
    %61 = vector.shape_cast %60 : vector<1x16x16xbf16> to vector<16x16xbf16>
    %cst_58 = arith.constant dense<0.000000e+00> : vector<16x640xf32>
    %62 = tpu.matmul %61, %59, %cst_58 {dimension_numbers = #tpu.dot_dimension_numbers<[1], [0], [0], [1], [0, 0, 1, 1], [], []>} : vector<16x16xbf16>, vector<16x640xbf16>, vector<16x640xf32> -> vector<16x640xf32>
    %63 = arith.addf %58, %62 : vector<16x640xf32>
    %c0_59 = arith.constant 0 : index
    %c83 = arith.constant 83 : index
    %64 = vector.load %arg9[%c0_59, %c83] : memref<16x1280xbf16, #tpu.memory_space<vmem>>, vector<16x640xbf16>
    %c11 = arith.constant 11 : index
    %c0_60 = arith.constant 0 : index
    %c0_61 = arith.constant 0 : index
    %65 = vector.load %arg2[%c11, %c0_60, %c0_61] : memref<16x16x16xbf16, #tpu.memory_space<vmem>>, vector<1x16x16xbf16>
    %66 = vector.shape_cast %65 : vector<1x16x16xbf16> to vector<16x16xbf16>
    %cst_62 = arith.constant dense<0.000000e+00> : vector<16x640xf32>
    %67 = tpu.matmul %66, %64, %cst_62 {dimension_numbers = #tpu.dot_dimension_numbers<[1], [0], [0], [1], [0, 0, 1, 1], [], []>} : vector<16x16xbf16>, vector<16x640xbf16>, vector<16x640xf32> -> vector<16x640xf32>
    %68 = arith.addf %63, %67 : vector<16x640xf32>
    %c0_63 = arith.constant 0 : index
    %c120 = arith.constant 120 : index
    %69 = vector.load %arg9[%c0_63, %c120] : memref<16x1280xbf16, #tpu.memory_space<vmem>>, vector<16x640xbf16>
    %c12 = arith.constant 12 : index
    %c0_64 = arith.constant 0 : index
    %c0_65 = arith.constant 0 : index
    %70 = vector.load %arg2[%c12, %c0_64, %c0_65] : memref<16x16x16xbf16, #tpu.memory_space<vmem>>, vector<1x16x16xbf16>
    %71 = vector.shape_cast %70 : vector<1x16x16xbf16> to vector<16x16xbf16>
    %cst_66 = arith.constant dense<0.000000e+00> : vector<16x640xf32>
    %72 = tpu.matmul %71, %69, %cst_66 {dimension_numbers = #tpu.dot_dimension_numbers<[1], [0], [0], [1], [0, 0, 1, 1], [], []>} : vector<16x16xbf16>, vector<16x640xbf16>, vector<16x640xf32> -> vector<16x640xf32>
    %73 = arith.addf %68, %72 : vector<16x640xf32>
    %c0_67 = arith.constant 0 : index
    %c121 = arith.constant 121 : index
    %74 = vector.load %arg9[%c0_67, %c121] : memref<16x1280xbf16, #tpu.memory_space<vmem>>, vector<16x640xbf16>
    %c13 = arith.constant 13 : index
    %c0_68 = arith.constant 0 : index
    %c0_69 = arith.constant 0 : index
    %75 = vector.load %arg2[%c13, %c0_68, %c0_69] : memref<16x16x16xbf16, #tpu.memory_space<vmem>>, vector<1x16x16xbf16>
    %76 = vector.shape_cast %75 : vector<1x16x16xbf16> to vector<16x16xbf16>
    %cst_70 = arith.constant dense<0.000000e+00> : vector<16x640xf32>
    %77 = tpu.matmul %76, %74, %cst_70 {dimension_numbers = #tpu.dot_dimension_numbers<[1], [0], [0], [1], [0, 0, 1, 1], [], []>} : vector<16x16xbf16>, vector<16x640xbf16>, vector<16x640xf32> -> vector<16x640xf32>
    %78 = arith.addf %73, %77 : vector<16x640xf32>
    %c0_71 = arith.constant 0 : index
    %c122 = arith.constant 122 : index
    %79 = vector.load %arg9[%c0_71, %c122] : memref<16x1280xbf16, #tpu.memory_space<vmem>>, vector<16x640xbf16>
    %c14 = arith.constant 14 : index
    %c0_72 = arith.constant 0 : index
    %c0_73 = arith.constant 0 : index
    %80 = vector.load %arg2[%c14, %c0_72, %c0_73] : memref<16x16x16xbf16, #tpu.memory_space<vmem>>, vector<1x16x16xbf16>
    %81 = vector.shape_cast %80 : vector<1x16x16xbf16> to vector<16x16xbf16>
    %cst_74 = arith.constant dense<0.000000e+00> : vector<16x640xf32>
    %82 = tpu.matmul %81, %79, %cst_74 {dimension_numbers = #tpu.dot_dimension_numbers<[1], [0], [0], [1], [0, 0, 1, 1], [], []>} : vector<16x16xbf16>, vector<16x640xbf16>, vector<16x640xf32> -> vector<16x640xf32>
    %83 = arith.addf %78, %82 : vector<16x640xf32>
    %c0_75 = arith.constant 0 : index
    %c123 = arith.constant 123 : index
    %84 = vector.load %arg9[%c0_75, %c123] : memref<16x1280xbf16, #tpu.memory_space<vmem>>, vector<16x640xbf16>
    %c15 = arith.constant 15 : index
    %c0_76 = arith.constant 0 : index
    %c0_77 = arith.constant 0 : index
    %85 = vector.load %arg2[%c15, %c0_76, %c0_77] : memref<16x16x16xbf16, #tpu.memory_space<vmem>>, vector<1x16x16xbf16>
    %86 = vector.shape_cast %85 : vector<1x16x16xbf16> to vector<16x16xbf16>
    %cst_78 = arith.constant dense<0.000000e+00> : vector<16x640xf32>
    %87 = tpu.matmul %86, %84, %cst_78 {dimension_numbers = #tpu.dot_dimension_numbers<[1], [0], [0], [1], [0, 0, 1, 1], [], []>} : vector<16x16xbf16>, vector<16x640xbf16>, vector<16x640xf32> -> vector<16x640xf32>
    %88 = arith.addf %83, %87 : vector<16x640xf32>
    %c0_79 = arith.constant 0 : index
    %c0_80 = arith.constant 0 : index
    %89 = vector.load %arg3[%c0_79, %c0_80] : memref<1x640xf32, #tpu.memory_space<vmem>>, vector<1x640xf32>
    %90 = vector.broadcast %89 : vector<1x640xf32> to vector<16x640xf32>
    %91 = arith.mulf %88, %90 : vector<16x640xf32>
    %92 = arith.truncf %91 : vector<16x640xf32> to vector<16x640xbf16>
    %c0_81 = arith.constant 0 : index
    %c0_82 = arith.constant 0 : index
    %c0_83 = arith.constant 0 : index
    %93 = vector.load %arg6[%c0_81, %c0_82, %c0_83] : memref<1x16x640xbf16, #tpu.memory_space<vmem>>, vector<1x16x640xbf16>
    %94 = vector.shape_cast %93 : vector<1x16x640xbf16> to vector<16x640xbf16>
    %95 = vector.shape_cast %92 : vector<16x640xbf16> to vector<1x16x640xbf16>
    tpu.vector_store %arg6[%c0_81, %c0_82, %c0_83], %95 {strides = array<i32>} : memref<1x16x640xbf16, #tpu.memory_space<vmem>>, vector<1x16x640xbf16>,
    %cst_84 = arith.constant dense<0.000000e+00> : vector<16xf32>
    %96 = vector.multi_reduction <add>, %91, %cst_84 [1] : vector<16x640xf32> to vector<16xf32>
    %97 = vector.shape_cast %96 : vector<16xf32> to vector<16x1xf32>
    %98 = arith.addf %6, %97 : vector<16x1xf32>
    %99 = arith.mulf %91, %91 : vector<16x640xf32>
    %cst_85 = arith.constant dense<0.000000e+00> : vector<16xf32>
    %100 = vector.multi_reduction <add>, %99, %cst_85 [1] : vector<16x640xf32> to vector<16xf32>
    %101 = vector.shape_cast %100 : vector<16xf32> to vector<16x1xf32>
    %102 = arith.addf %7, %101 : vector<16x1xf32>
    %c0_86 = arith.constant 0 : index
    %c0_87 = arith.constant 0 : index
    %c0_88 = arith.constant 0 : index
    %103 = vector.load %arg7[%c0_86, %c0_87, %c0_88] : memref<1x16x1xf32, #tpu.memory_space<vmem>>, vector<1x16x1xf32>
    %104 = vector.shape_cast %103 : vector<1x16x1xf32> to vector<16x1xf32>
    %105 = vector.shape_cast %98 : vector<16x1xf32> to vector<1x16x1xf32>
    tpu.vector_store %arg7[%c0_86, %c0_87, %c0_88], %105 {strides = array<i32>} : memref<1x16x1xf32, #tpu.memory_space<vmem>>, vector<1x16x1xf32>,
    %c0_89 = arith.constant 0 : index
    %c0_90 = arith.constant 0 : index
    %c0_91 = arith.constant 0 : index
    %106 = vector.load %arg8[%c0_89, %c0_90, %c0_91] : memref<1x16x1xf32, #tpu.memory_space<vmem>>, vector<1x16x1xf32>
    %107 = vector.shape_cast %106 : vector<1x16x1xf32> to vector<16x1xf32>
    %108 = vector.shape_cast %102 : vector<16x1xf32> to vector<1x16x1xf32>
    tpu.vector_store %arg8[%c0_89, %c0_90, %c0_91], %108 {strides = array<i32>} : memref<1x16x1xf32, #tpu.memory_space<vmem>>, vector<1x16x1xf32>,
    return
  }
  func.func @transform_0(%arg0: i32, %arg1: i32) -> (i32, i32, i32) {
    %c0_i32 = arith.constant 0 : i32
    %c0_i32_0 = arith.constant 0 : i32
    %c0_i32_1 = arith.constant 0 : i32
    %c0_i32_2 = arith.constant 0 : i32
    return %c0_i32, %c0_i32_0, %c0_i32_1 : i32, i32, i32
  }
  func.func @transform_1(%arg0: i32, %arg1: i32) -> (i32, i32) {
    %c0_i32 = arith.constant 0 : i32
    %c0_i32_0 = arith.constant 0 : i32
    %c0_i32_1 = arith.constant 0 : i32
    return %c0_i32, %c0_i32_0 : i32, i32
  }
  func.func @transform_2(%arg0: i32, %arg1: i32) -> (i32, i32, i32) {
    %c0_i32 = arith.constant 0 : i32
    %c0_i32_0 = arith.constant 0 : i32
    return %arg0, %c0_i32, %arg1 : i32, i32, i32
  }
  func.func @transform_3(%arg0: i32, %arg1: i32) -> (i32, i32, i32) {
    %c1_i32 = arith.constant 1 : i32
    %0 = arith.addi %arg1, %c1_i32 : i32
    %c1_i32_0 = arith.constant 1 : i32
    %1 = arith.muli %0, %c1_i32_0 : i32
    %c0_i32 = arith.constant 0 : i32
    %c0_i32_1 = arith.constant 0 : i32
    return %arg0, %c0_i32, %1 : i32, i32, i32
  }
  func.func @transform_4(%arg0: i32, %arg1: i32) -> (i32, i32, i32) {
    %c0_i32 = arith.constant 0 : i32
    %c0_i32_0 = arith.constant 0 : i32
    return %arg0, %c0_i32, %arg1 : i32, i32, i32
  }
  func.func @transform_5(%arg0: i32, %arg1: i32) -> (i32, i32, i32) {
    %c2_i32 = arith.constant 2 : i32
    %0 = arith.muli %arg0, %c2_i32 : i32
    %1 = arith.addi %0, %arg1 : i32
    %c0_i32 = arith.constant 0 : i32
    %c0_i32_0 = arith.constant 0 : i32
    %c0_i32_1 = arith.constant 0 : i32
    return %1, %c0_i32, %c0_i32_0 : i32, i32, i32
  }
  func.func @transform_6(%arg0: i32, %arg1: i32) -> (i32, i32, i32) {
    %c2_i32 = arith.constant 2 : i32
    %0 = arith.muli %arg0, %c2_i32 : i32
    %1 = arith.addi %0, %arg1 : i32
    %c0_i32 = arith.constant 0 : i32
    %c0_i32_0 = arith.constant 0 : i32
    %c0_i32_1 = arith.constant 0 : i32
    return %1, %c0_i32, %c0_i32_0 : i32, i32, i32
  }
}

module attributes {stable_mosaic.version = 11 : i64} {
  func.func @_bn_relu_crop_kernel(%arg0: i32, %arg1: i32, %arg2: memref<1x16x8x40xbf16, #tpu.memory_space<vmem>>, %arg3: memref<16x1x1xf32, #tpu.memory_space<vmem>>, %arg4: memref<16x1x1xf32, #tpu.memory_space<vmem>>, %arg5: memref<1x16x8x32xf32, #tpu.memory_space<vmem>>) attributes {dimension_semantics = [#tpu.dimension_semantics<parallel>, #tpu.dimension_semantics<parallel>], iteration_bounds = array<i64: 2, 4>, scalar_prefetch = 0 : i64, scratch_operands = 0 : i64, tpu.core_type = #tpu.core_type<tc>, window_params = [{transform_indices = @transform_0, window_bounds = array<i64: 1, 16, 8, 40>}, {pipeline_mode = #tpu.pipeline_mode<synchronous>, transform_indices = @transform_1, window_bounds = array<i64: 16, 1, 1>}, {pipeline_mode = #tpu.pipeline_mode<synchronous>, transform_indices = @transform_2, window_bounds = array<i64: 16, 1, 1>}, {transform_indices = @transform_3, window_bounds = array<i64: 1, 16, 8, 32>}]} {
    %c0 = arith.constant 0 : index
    %c0_0 = arith.constant 0 : index
    %c0_1 = arith.constant 0 : index
    %c0_2 = arith.constant 0 : index
    %0 = vector.load %arg2[%c0, %c0_0, %c0_1, %c0_2] : memref<1x16x8x40xbf16, #tpu.memory_space<vmem>>, vector<1x16x8x32xbf16>
    %1 = vector.shape_cast %0 : vector<1x16x8x32xbf16> to vector<16x8x32xbf16>
    %2 = arith.extf %1 : vector<16x8x32xbf16> to vector<16x8x32xf32>
    %c0_3 = arith.constant 0 : index
    %c0_4 = arith.constant 0 : index
    %c0_5 = arith.constant 0 : index
    %3 = vector.load %arg3[%c0_3, %c0_4, %c0_5] : memref<16x1x1xf32, #tpu.memory_space<vmem>>, vector<16x1x1xf32>
    %4 = vector.broadcast %3 : vector<16x1x1xf32> to vector<16x8x32xf32>
    %5 = arith.mulf %2, %4 : vector<16x8x32xf32>
    %c0_6 = arith.constant 0 : index
    %c0_7 = arith.constant 0 : index
    %c0_8 = arith.constant 0 : index
    %6 = vector.load %arg4[%c0_6, %c0_7, %c0_8] : memref<16x1x1xf32, #tpu.memory_space<vmem>>, vector<16x1x1xf32>
    %7 = vector.broadcast %6 : vector<16x1x1xf32> to vector<16x8x32xf32>
    %8 = arith.addf %5, %7 : vector<16x8x32xf32>
    %cst = arith.constant 0.000000e+00 : f32
    %9 = vector.broadcast %cst : f32 to vector<16x8x32xf32>
    %10 = arith.maximumf %8, %9 : vector<16x8x32xf32>
    %c0_9 = arith.constant 0 : index
    %c0_10 = arith.constant 0 : index
    %c0_11 = arith.constant 0 : index
    %c0_12 = arith.constant 0 : index
    %11 = vector.load %arg5[%c0_9, %c0_10, %c0_11, %c0_12] : memref<1x16x8x32xf32, #tpu.memory_space<vmem>>, vector<1x16x8x32xf32>
    %12 = vector.shape_cast %11 : vector<1x16x8x32xf32> to vector<16x8x32xf32>
    %13 = vector.shape_cast %10 : vector<16x8x32xf32> to vector<1x16x8x32xf32>
    tpu.vector_store %arg5[%c0_9, %c0_10, %c0_11, %c0_12], %13 {strides = array<i32>} : memref<1x16x8x32xf32, #tpu.memory_space<vmem>>, vector<1x16x8x32xf32>,
    return
  }
  func.func @transform_0(%arg0: i32, %arg1: i32) -> (i32, i32, i32, i32) {
    %c0_i32 = arith.constant 0 : i32
    %c0_i32_0 = arith.constant 0 : i32
    %c0_i32_1 = arith.constant 0 : i32
    return %arg0, %c0_i32, %arg1, %c0_i32_0 : i32, i32, i32, i32
  }
  func.func @transform_1(%arg0: i32, %arg1: i32) -> (i32, i32, i32) {
    %c0_i32 = arith.constant 0 : i32
    %c0_i32_0 = arith.constant 0 : i32
    %c0_i32_1 = arith.constant 0 : i32
    %c0_i32_2 = arith.constant 0 : i32
    return %c0_i32, %c0_i32_0, %c0_i32_1 : i32, i32, i32
  }
  func.func @transform_2(%arg0: i32, %arg1: i32) -> (i32, i32, i32) {
    %c0_i32 = arith.constant 0 : i32
    %c0_i32_0 = arith.constant 0 : i32
    %c0_i32_1 = arith.constant 0 : i32
    %c0_i32_2 = arith.constant 0 : i32
    return %c0_i32, %c0_i32_0, %c0_i32_1 : i32, i32, i32
  }
  func.func @transform_3(%arg0: i32, %arg1: i32) -> (i32, i32, i32, i32) {
    %c0_i32 = arith.constant 0 : i32
    %c0_i32_0 = arith.constant 0 : i32
    %c0_i32_1 = arith.constant 0 : i32
    return %arg0, %c0_i32, %arg1, %c0_i32_0 : i32, i32, i32, i32
  }
}

</mosaic_0001>

<bundles_post_ra>
// kernel: rot_deconv2d_forward.3
= control target key start
LH: loop header
LB: loop body
LE: loop exit
PB: predicated region body
PF: predicated region fallthrough
CT: control target
= control target key end

     0   :  { %8 = vsyncpa [#allocation4], 0  ;;  %s1318_s0 = inlined_call_operand.vmem [shape: bf16[2,16,32,40], index: 0, kind: input, shape index: {}]   ;;  %s1319_s1 = inlined_call_operand.vmem [shape: f32[16,1,1], index: 1, kind: input, shape index: {}]   ;;  %s1320_s2 = inlined_call_operand.vmem [shape: f32[16,1,1], index: 2, kind: input, shape index: {}]   ;;  %s1321_s3 = inlined_call_operand.hbm [shape: f32[2,16,32,32], index: 3, kind: output, shape index: {}]  }
   0x1   :  { %10 = vsyncpa [#allocation4 + $0x1], 0  ;;  %s995_s12 = smov 0   ;;  %s997_s13 = smov 0  }
   0x2   :  { %s999_s14 = smov 0   ;;  %s1001_s15 = smov 0  }
   0x3   :  { %s1003_s16 = smov 0   ;;  %s1005_s17 = smov 0  }
   0x4   :  { %s1007_s18 = smov 0   ;;  %s1009_s19 = smov 0  }
   0x5 LB: > { %s711_s20 = sadd.s32 4294967295, %s969_s19   ;;  %s712_s21 = sadd.s32 4294967294, %s969_s19   ;;  %s969_s19 = sphi %s1009_s19, %s16_s19   ;;  %s965_s18 = sphi %s1007_s18, %s1331_s18   ;;  %s961_s17 = sphi %s1005_s17, %s1330_s17   ;;  %s957_s16 = sphi %s1003_s16, %s1329_s16   ;;  %s953_s15 = sphi %s1001_s15, %s1328_s15   ;;  %s949_s14 = sphi %s999_s14, %s1327_s14   ;;  %s945_s13 = sphi %s997_s13, %s1326_s13   ;;  %s941_s12 = sphi %s995_s12, %s1325_s12  }
   0x6   : > { %s25_s22 = sadd.s32 1, %s961_s17  ;;  %s28_s23 = sadd.s32 1, %s965_s18 }
   0x7   : > { %p26_p0 = scmp.ge.s32.totalorder %s25_s22, 4  ;;  %p44_p1 = scmp.ne.s32.totalorder %s949_s14, %s945_s13 }
   0x8   : > { %p45_p2 = scmp.eq.s32.totalorder %s969_s19, 0  ;;  %p118_p5 = scmp.eq.s32.totalorder %s711_s20, 7 }
   0x9   : > { %s1333_s22 = smov (%p26_p0, %s25_s22), 0  ;;  %s1335_s23 = smov (!%p26_p0, %s28_s23), %s965_s18 }
   0xa   : > { %s33_s24 = ssub.s32 %s961_s17, %s1333_s22  ;;  %p1047_p3 = por %p45_p2, %p44_p1 }
   0xb   : > { %p30_p4 = scmp.ge.s32.totalorder %s1335_s23, 2  ;;  %p123_p6 = scmp.ne.s32.totalorder %s945_s13, %s941_s12 }
   0xc   : > { %p124_p7 = scmp.eq.s32.totalorder %s712_s21, 7  ;;  %p1055_p8 = por %p118_p5, %p44_p1 }
   0xd   : > { %s1337_s23 = smov (%p30_p4, %s1335_s23), 0  ;;  %s37_s30 = sadd.s32 1, %s949_s14 }
   0xe   : > { %p1059_p9 = por %p124_p7, %p123_p6  ;;  %s32_s28 = ssub.s32 %s965_s18, %s1337_s23 }
   0xf   : > { %s34_s29 = sor.u32 %s33_s24, %s32_s28  ;;  %p714_p11 = scmp.ge.s32.totalorder %s969_s19, 8 }
  0x10   : > { %p35_p10 = scmp.eq.s32.totalorder %s34_s29, 0 }
  0x11   : > { %146 = sbr.rel (%p714_p11) target bundleno = 44 (0x2c), region = 24 }
  0x12   : > { %s1067_s4 = scalar_select %p35_p10, %s949_s14, %s37_s30  }
  0x16   : > { %149 = sbr.rel (!%p1047_p3) target bundleno = 44 (0x2c), region = 28  ;;  %s151_s5 = sand.u32 (%p1047_p3), 1, %s949_s14  }
  0x17   : > { %s716_s6 = sshll.u32 (%p1047_p3), %s965_s18, 6  ;;  %s715_s7 = sshll.u32 (%p1047_p3), %s151_s5, 6 }
  0x18   : > { %s155_s8 = sadd.s32 (%p1047_p3), %s961_s17, %s716_s6  ;;  %s153_s21 = scalar_lea.vmem (%p1047_p3), [#allocation2], %s715_s7 }
  0x19   : > { %s717_s9 = sshll.u32 (%p1047_p3), %s155_s8, 2 }
  0x1a   : > { %s1078_s20 = scalar_lea.vmem (%p1047_p3), %s1318_s0, %s717_s9 }
  0x1b   : > { %v174_v0 = vld [vmem:[%s1078_s20] sm:$0xf]  ;;  %v176_v1 = vld [vmem:[%s1078_s20 + $0x10] sm:$0xf] }
  0x1c   : > { %v178_v2 = vld [vmem:[%s1078_s20 + $0x20] sm:$0xf]  ;;  %175 = vst [vmem:[%s153_s21] sm:$0xf] %v174_v0  ;;  %v180_v3 = vld [vmem:[%s1078_s20 + $0x30] sm:$0xf] }
  0x1d   : > { %177 = vst [vmem:[%s153_s21 + $0x4] sm:$0xf] %v176_v1  ;;  %v182_v4 = vld [vmem:[%s1078_s20 + $0x40] sm:$0xf]  ;;  %v184_v5 = vld [vmem:[%s1078_s20 + $0x50] sm:$0xf] }
  0x1e   : > { %179 = vst [vmem:[%s153_s21 + $0x8] sm:$0xf] %v178_v2  ;;  %v186_v6 = vld [vmem:[%s1078_s20 + $0x60] sm:$0xf]  ;;  %v188_v7 = vld [vmem:[%s1078_s20 + $0x70] sm:$0xf] }
  0x1f   : > { %181 = vst [vmem:[%s153_s21 + $0xc] sm:$0xf] %v180_v3  ;;  %v190_v8 = vld [vmem:[%s1078_s20 + $0x80] sm:$0xf]  ;;  %v192_v9 = vld [vmem:[%s1078_s20 + $0x90] sm:$0xf] }
  0x20   : > { %183 = vst [vmem:[%s153_s21 + $0x10] sm:$0xf] %v182_v4  ;;  %v194_v10 = vld [vmem:[%s1078_s20 + $0xa0] sm:$0xf]  ;;  %v196_v11 = vld [vmem:[%s1078_s20 + $0xb0] sm:$0xf] }
  0x21   : > { %185 = vst [vmem:[%s153_s21 + $0x14] sm:$0xf] %v184_v5  ;;  %v198_v12 = vld [vmem:[%s1078_s20 + $0xc0] sm:$0xf]  ;;  %v200_v13 = vld [vmem:[%s1078_s20 + $0xd0] sm:$0xf] }
  0x22   : > { %187 = vst [vmem:[%s153_s21 + $0x18] sm:$0xf] %v186_v6  ;;  %v202_v14 = vld [vmem:[%s1078_s20 + $0xe0] sm:$0xf]  ;;  %v204_v15 = vld [vmem:[%s1078_s20 + $0xf0] sm:$0xf] }
  0x23   : > { %189 = vst [vmem:[%s153_s21 + $0x1c] sm:$0xf] %v188_v7 }
  0x24   : > { %191 = vst [vmem:[%s153_s21 + $0x20] sm:$0xf] %v190_v8 }
  0x25   : > { %193 = vst [vmem:[%s153_s21 + $0x24] sm:$0xf] %v192_v9 }
  0x26   : > { %195 = vst [vmem:[%s153_s21 + $0x28] sm:$0xf] %v194_v10 }
  0x27   : > { %197 = vst [vmem:[%s153_s21 + $0x2c] sm:$0xf] %v196_v11 }
  0x28   : > { %199 = vst [vmem:[%s153_s21 + $0x30] sm:$0xf] %v198_v12 }
  0x29   : > { %201 = vst [vmem:[%s153_s21 + $0x34] sm:$0xf] %v200_v13 }
  0x2a   : > { %203 = vst [vmem:[%s153_s21 + $0x38] sm:$0xf] %v202_v14 }
  0x2b   : > { %205 = vst [vmem:[%s153_s21 + $0x3c] sm:$0xf] %v204_v15 }
  0x2c PF: > { %p718_p12 = scmp.ge.s32.totalorder %s969_s19, 1  ;;  %p260_p13 = scmp.lt.s32.totalorder %s969_s19, 9 }
  0x2e   : > { %p261_p0 = pnand %p718_p12, %p260_p13 }
  0x2f   : > { %s1199_s8 = sand.u32 (!%p261_p0), 1, %s945_s13   ;;  %s722_s21 = sshll.u32 (!%p261_p0), %s957_s16, 6 }
  0x30   : > { %264 = sbr.rel (%p261_p0) target bundleno = 261 (0x105), region = 69  ;;  %s719_s9 = sshll.u32 (!%p261_p0), %s1199_s8, 6 }
  0x31   : > { %s1204_s10 = scalar_lea.vmem (!%p261_p0), [#allocation2], %s719_s9  ;;  %s720_s11 = sshll.u32 (!%p261_p0), %s1199_s8, 7 }
  0x32   : > { %s1218_s20 = scalar_lea.vmem (!%p261_p0), [#allocation3], %s720_s11  ;;  %s622_s24 = sadd.s32 (!%p261_p0), %s953_s15, %s722_s21 }
  0x33   : > { %s723_s25 = sshll.u32 (!%p261_p0), %s622_s24, 3  ;;  %s625_s29 = sshll.u32 (!%p261_p0), %s1218_s20, 4  ;;  %s626_s29 = int_to_ptr.vmem [resolvable:$true] %s625_s29 }
  0x34   : > { %s624_s15 = scalar_lea.hbm (!%p261_p0), %s1321_s3, %s723_s25  ;;  %s612_s5 = scalar_lea.sflag (!%p261_p0), [#allocation4], %s1199_s8 }
  0x35   : > { %v843_v16 = vld [vmem:[%s1319_s1 + $0x4] ss:$0 sm:$0xff]  ;;  %v971_v17 = vmov 0   ;;  %v844_v18 = vld [vmem:[%s1319_s1 + $0x2] ss:$0 sm:$0xff]  ;;  %v1207_v55 = vld [vmem:[%s1204_s10 + $0x38] sm:$0xff]  }
  0x36   : > { %842 = vset.pattern.permute.xlu2 %v971_v17  ;;  %841 = vset.pattern.permute.xlu1 %v971_v17  ;;  %v845_v19 = vld [vmem:[%s1319_s1] ss:$0 sm:$0xff]  ;;  %v846_v20 = vld [vmem:[%s1319_s1 + $0x5] ss:$0 sm:$0xff]  ;;  %v847_v21 = vld [vmem:[%s1319_s1 + $0x3] ss:$0 sm:$0xff]  ;;  %v756_v56 = vunpack.c.l.bf16 %v1207_v55 }
  0x37   : > { %840 = vset.pattern.permute.xlu0 %v971_v17  ;;  %387 = vperm.xlu2 %842, %v843_v16   ;;  %v848_v22 = vld [vmem:[%s1319_s1 + $0x1] ss:$0 sm:$0xff]  ;;  %v849_v23 = vld [vmem:[%s1319_s1 + $0x8] ss:$0 sm:$0xff]  ;;  %v850_v24 = vld [vmem:[%s1319_s1 + $0x7] ss:$0 sm:$0xff] }
  0x38   : > { %379 = vperm.xlu1 %841, %v844_v18   ;;  %371 = vperm.xlu0 %840, %v845_v19   ;;  %v851_v25 = vld [vmem:[%s1319_s1 + $0x6] ss:$0 sm:$0xff]  ;;  %v852_v26 = vld [vmem:[%s1319_s1 + $0xb] ss:$0 sm:$0xff]  ;;  %v853_v27 = vld [vmem:[%s1319_s1 + $0xa] ss:$0 sm:$0xff] }
  0x39   : > { %v854_v28 = vld [vmem:[%s1319_s1 + $0x9] ss:$0 sm:$0xff]  ;;  %v855_v29 = vld [vmem:[%s1319_s1 + $0xe] ss:$0 sm:$0xff]  ;;  %v856_v30 = vld [vmem:[%s1319_s1 + $0xd] ss:$0 sm:$0xff] }
  0x3a   : > { %v857_v31 = vld [vmem:[%s1319_s1 + $0xc] ss:$0 sm:$0xff]  ;;  %v858_v32 = vld [vmem:[%s1320_s2 + $0x1] ss:$0 sm:$0xff]  ;;  %v859_v33 = vld [vmem:[%s1320_s2] ss:$0 sm:$0xff] }
  0x3b   : > { %v860_v34 = vld [vmem:[%s1319_s1 + $0xf] ss:$0 sm:$0xff]  ;;  %v861_v35 = vld [vmem:[%s1320_s2 + $0x4] ss:$0 sm:$0xff]  ;;  %v862_v36 = vld [vmem:[%s1320_s2 + $0x3] ss:$0 sm:$0xff] }
  0x3c   : > { %v863_v37 = vld [vmem:[%s1320_s2 + $0x2] ss:$0 sm:$0xff]  ;;  %v864_v38 = vld [vmem:[%s1320_s2 + $0x7] ss:$0 sm:$0xff]  ;;  %v865_v39 = vld [vmem:[%s1320_s2 + $0x6] ss:$0 sm:$0xff] }
  0x3d   : > { %v866_v40 = vld [vmem:[%s1320_s2 + $0x5] ss:$0 sm:$0xff]  ;;  %v867_v41 = vld [vmem:[%s1320_s2 + $0xa] ss:$0 sm:$0xff]  ;;  %v868_v42 = vld [vmem:[%s1320_s2 + $0x9] ss:$0 sm:$0xff] }
  0x3e   : > { %v869_v43 = vld [vmem:[%s1320_s2 + $0x8] ss:$0 sm:$0xff]  ;;  %v870_v44 = vld [vmem:[%s1320_s2 + $0xd] ss:$0 sm:$0xff]  ;;  %v871_v45 = vld [vmem:[%s1320_s2 + $0xc] ss:$0 sm:$0xff] }
  0x3f   : > { %391 = vperm.xlu2 %842, %v846_v20   ;;  %v872_v46 = vld [vmem:[%s1320_s2 + $0xb] ss:$0 sm:$0xff]  ;;  %v873_v47 = vld [vmem:[%s1320_s2 + $0xf] ss:$0 sm:$0xff]  ;;  %v874_v48 = vld [vmem:[%s1320_s2 + $0xe] ss:$0 sm:$0xff] }
  0x40   : > { %383 = vperm.xlu1 %841, %v847_v21   ;;  %375 = vperm.xlu0 %840, %v848_v22   ;;  %v727_v60 = vld [vmem:[%s1204_s10] sm:$0xff]   ;;  %v1215_v0 = vld [vmem:[%s1204_s10 + $0x10] sm:$0xff]   ;;  %vm594_vm0 = vcmask 261120   ;;  %v760_v8 = vld [vmem:[%s1204_s10 + $0x18] sm:$0xff]   ;;  %s627_s30 = sshll.u32 %s624_s15, 4  ;;  %s895_s11 = scalar_lea.hbm %s1321_s3, 1024  ;;  %s628_s30 = int_to_ptr.hbm [resolvable:$true] %s627_s30 }
  0x41   : > { %v729_v62 = vunpack.c.h.bf16 %v727_v60  ;;  %v736_v5 = vunpack.c.l.bf16 %v1215_v0  ;;  %v741_v13 = vunpack.c.h.bf16 %v760_v8  ;;  %v1226_v19 = vld [vmem:[%s1204_s10 + $0x28] sm:$0xff]   ;;  %s889_s6 = sshra.s32 %s628_s30, 4  ;;  %s890_s6 = int_to_ptr.hbm [resolvable:$true] %s889_s6 }
  0x42   : > { %v748_v21 = vunpack.c.l.bf16 %v1226_v19  ;;  %s891_s7 = scalar_lea.hbm %s890_s6, 128  ;;  %p896_p4 = scmp.lt.s32.totalorder %s890_s6, %s1321_s3 }
  0x43   : > { %p892_p1 = scmp.ne.s32.totalorder %s890_s6, %s891_s7  ;;  %p897_p5 = scmp.lt.s32.totalorder %s895_s11, %s891_s7 }
  0x45   : > { %p893_p2 = pnand %p892_p1, %p1055_p8  ;;  %p898_p6 = por %p897_p5, %p896_p4 }
  0x47   : > { %403 = vperm.xlu2 %842, %v849_v23   ;;  %v728_v23 = vunpack.c.l.bf16 %v727_v60  ;;  %v761_v60 = vld [vmem:[%s1204_s10 + $0x20] sm:$0xff]   ;;  %p894_p3 = pneg %p893_p2 }
  0x48   : > { %399 = vperm.xlu1 %841, %v850_v24   ;;  %395 = vperm.xlu0 %840, %v851_v25  }
  0x49   : > { %p899_p7 = pnand %p898_p6, %p894_p3 }
  0x4f   : > { %415 = vperm.xlu2 %842, %v852_v26   ;;  %v763_v26 = vld [vmem:[%s1204_s10 + $0x30] sm:$0xff]  }
  0x50   : > { %411 = vperm.xlu1 %841, %v853_v27   ;;  %407 = vperm.xlu0 %840, %v854_v28  }
  0x57   : > { %427 = vperm.xlu2 %842, %v855_v29  }
  0x58   : > { %423 = vperm.xlu1 %841, %v856_v30   ;;  %419 = vperm.xlu0 %840, %v857_v31   ;;  %v758_v30 = vld [vmem:[%s1204_s10 + $0x8] sm:$0xff]  }
  0x5f   : > { %503 = vperm.xlu2 %842, %v858_v32  }
  0x60   : > { %499 = vperm.xlu1 %841, %v859_v33   ;;  %431 = vperm.xlu0 %840, %v860_v34   ;;  %v753_v33 = vunpack.c.h.bf16 %v763_v26 }
  0x67   : > { %515 = vperm.xlu2 %842, %v861_v35   ;;  %v733_v35 = vunpack.c.h.bf16 %v758_v30 }
  0x68   : > { %511 = vperm.xlu1 %841, %v862_v36   ;;  %507 = vperm.xlu0 %840, %v863_v37   ;;  %v732_v37 = vunpack.c.l.bf16 %v758_v30 }
  0x6f   : > { %527 = vperm.xlu2 %842, %v864_v38  }
  0x70   : > { %523 = vperm.xlu1 %841, %v865_v39   ;;  %519 = vperm.xlu0 %840, %v866_v40  }
  0x77   : > { %539 = vperm.xlu2 %842, %v867_v41  }
  0x78   : > { %535 = vperm.xlu1 %841, %v868_v42   ;;  %531 = vperm.xlu0 %840, %v869_v43  }
  0x7f   : > { %551 = vperm.xlu2 %842, %v870_v44  }
  0x80   : > { %547 = vperm.xlu1 %841, %v871_v45   ;;  %543 = vperm.xlu0 %840, %v872_v46  }
  0x88   : > { %559 = vperm.xlu1 %841, %v873_v47   ;;  %555 = vperm.xlu0 %840, %v874_v48   ;;  %v740_v48 = vunpack.c.l.bf16 %v760_v8 }
  0x91   : > { %v388_v49 = vpop.permute.xlu2 %387 }
  0x92   : > { %v438_v7 = vmul.f32 %v736_v5, %v388_v49 }
  0x99   : > { %v1194_v50 = vpop.permute.xlu2 %391 }
  0xa1   : > { %v1196_v51 = vpop.permute.xlu2 %403 }
  0xa9   : > { %v1202_v52 = vpop.permute.xlu2 %415 }
  0xaa   : > { %v380_v53 = vpop.permute.xlu1 %379  ;;  %v372_v54 = vpop.permute.xlu0 %371 }
  0xab   : > { %v434_v25 = vmul.f32 %v728_v23, %v372_v54  ;;  %v436_v41 = vmul.f32 %v732_v37, %v380_v53  ;;  %v737_v54 = vunpack.c.h.bf16 %v1215_v0 }
  0xb1   : > { %v428_v57 = vpop.permute.xlu2 %427 }
  0xb2   : > { %v1210_v58 = vmul.f32 %v756_v56, %v428_v57  ;;  %v384_v59 = vpop.permute.xlu1 %383  ;;  %v376_v61 = vpop.permute.xlu0 %375  ;;  %v439_v57 = vmul.f32 %v737_v54, %v1194_v50 }
  0xb3   : > { %v435_v63 = vmul.f32 %v729_v62, %v376_v61  ;;  %v437_v39 = vmul.f32 %v733_v35, %v384_v59 }
  0xb9   : > { %v504_v1 = vpop.permute.xlu2 %503 }
  0xba   : > { %v563_v2 = vadd.f32 %v504_v1, %v435_v63  ;;  %v400_v3 = vpop.permute.xlu1 %399  ;;  %v396_v4 = vpop.permute.xlu0 %395  ;;  %v745_v1 = vunpack.c.h.bf16 %v761_v60 }
  0xbb   : > { %v441_v15 = vmul.f32 %v741_v13, %v400_v3  ;;  %v440_v53 = vmul.f32 %v740_v48, %v396_v4 }
  0xbc   : > { %v579_v6 = vmax.f32 %v563_v2, 0.0  ;;  %v744_v2 = vunpack.c.l.bf16 %v761_v60 }
  0xbe   : > { %596 = vst.msk [vmem:[%s1218_s20 + $0x8] sm:$0xff] %vm594_vm0, %v579_v6  ;;  %v442_v50 = vmul.f32 %v744_v2, %v1196_v51 }
  0xc1   : > { %v516_v9 = vpop.permute.xlu2 %515 }
  0xc2   : > { %v566_v10 = vadd.f32 %v516_v9, %v438_v7  ;;  %v412_v11 = vpop.permute.xlu1 %411  ;;  %v408_v12 = vpop.permute.xlu0 %407  ;;  %v752_v9 = vunpack.c.l.bf16 %v763_v26 }
  0xc3   : > { %v444_v24 = vmul.f32 %v748_v21, %v412_v11  ;;  %v443_v4 = vmul.f32 %v745_v1, %v408_v12  ;;  %v749_v11 = vunpack.c.h.bf16 %v1226_v19 }
  0xc4   : > { %v582_v14 = vmax.f32 %v566_v10, 0.0 }
  0xc5   : > { %v445_v51 = vmul.f32 %v749_v11, %v1202_v52 }
  0xc6   : > { %599 = vst.msk [vmem:[%s1218_s20 + $0x20] sm:$0xff] %vm594_vm0, %v582_v14 }
  0xc9   : > { %v528_v16 = vpop.permute.xlu2 %527 }
  0xca   : > { %v569_v17 = vadd.f32 %v528_v16, %v441_v15  ;;  %v424_v18 = vpop.permute.xlu1 %423  ;;  %v1228_v20 = vpop.permute.xlu0 %419 }
  0xcb   : > { %v447_v38 = vmul.f32 %v753_v33, %v424_v18  ;;  %v446_v12 = vmul.f32 %v752_v9, %v1228_v20  ;;  %v757_v18 = vunpack.c.h.bf16 %v1207_v55 }
  0xcc   : > { %v585_v22 = vmax.f32 %v569_v17, 0.0 }
  0xce   : > { %602 = vst.msk [vmem:[%s1218_s20 + $0x38] sm:$0xff] %vm594_vm0, %v585_v22 }
  0xd1   : > { %v540_v27 = vpop.permute.xlu2 %539 }
  0xd2   : > { %v572_v28 = vadd.f32 %v540_v27, %v444_v24  ;;  %v500_v29 = vpop.permute.xlu1 %499  ;;  %v1235_v32 = vpop.permute.xlu0 %431 }
  0xd3   : > { %v562_v31 = vadd.f32 %v500_v29, %v434_v25  ;;  %v449_v52 = vmul.f32 %v757_v18, %v1235_v32 }
  0xd4   : > { %v588_v34 = vmax.f32 %v572_v28, 0.0 }
  0xd5   : > { %v578_v36 = vmax.f32 %v562_v31, 0.0 }
  0xd6   : > { %605 = vst.msk [vmem:[%s1218_s20 + $0x50] sm:$0xff] %vm594_vm0, %v588_v34 }
  0xd7   : > { %595 = vst.msk [vmem:[%s1218_s20] sm:$0xff] %vm594_vm0, %v578_v36 }
  0xd9   : > { %v552_v40 = vpop.permute.xlu2 %551 }
  0xda   : > { %v575_v42 = vadd.f32 %v552_v40, %v447_v38  ;;  %v512_v43 = vpop.permute.xlu1 %511  ;;  %v508_v45 = vpop.permute.xlu0 %507 }
  0xdb   : > { %v565_v44 = vadd.f32 %v512_v43, %v437_v39  ;;  %v564_v47 = vadd.f32 %v508_v45, %v436_v41 }
  0xdc   : > { %v591_v46 = vmax.f32 %v575_v42, 0.0 }
  0xdd   : > { %v581_v49 = vmax.f32 %v565_v44, 0.0  ;;  %v580_v56 = vmax.f32 %v564_v47, 0.0 }
  0xde   : > { %608 = vst.msk [vmem:[%s1218_s20 + $0x68] sm:$0xff] %vm594_vm0, %v591_v46 }
  0xdf   : > { %598 = vst.msk [vmem:[%s1218_s20 + $0x18] sm:$0xff] %vm594_vm0, %v581_v49 }
  0xe0   : > { %597 = vst.msk [vmem:[%s1218_s20 + $0x10] sm:$0xff] %vm594_vm0, %v580_v56 }
  0xe2   : > { %v524_v59 = vpop.permute.xlu1 %523  ;;  %v520_v62 = vpop.permute.xlu0 %519 }
  0xe3   : > { %v568_v61 = vadd.f32 %v524_v59, %v440_v53  ;;  %v567_v63 = vadd.f32 %v520_v62, %v439_v57 }
  0xe5   : > { %v584_v0 = vmax.f32 %v568_v61, 0.0  ;;  %v583_v3 = vmax.f32 %v567_v63, 0.0 }
  0xe7   : > { %601 = vst.msk [vmem:[%s1218_s20 + $0x30] sm:$0xff] %vm594_vm0, %v584_v0 }
  0xe8   : > { %600 = vst.msk [vmem:[%s1218_s20 + $0x28] sm:$0xff] %vm594_vm0, %v583_v3 }
  0xea   : > { %v536_v5 = vpop.permute.xlu1 %535  ;;  %v532_v7 = vpop.permute.xlu0 %531 }
  0xeb   : > { %v571_v6 = vadd.f32 %v536_v5, %v443_v4  ;;  %v570_v8 = vadd.f32 %v532_v7, %v442_v50 }
  0xed   : > { %v587_v10 = vmax.f32 %v571_v6, 0.0  ;;  %v586_v13 = vmax.f32 %v570_v8, 0.0 }
  0xef   : > { %604 = vst.msk [vmem:[%s1218_s20 + $0x48] sm:$0xff] %vm594_vm0, %v587_v10 }
  0xf0   : > { %603 = vst.msk [vmem:[%s1218_s20 + $0x40] sm:$0xff] %vm594_vm0, %v586_v13 }
  0xf2   : > { %v548_v14 = vpop.permute.xlu1 %547  ;;  %v544_v16 = vpop.permute.xlu0 %543 }
  0xf3   : > { %v574_v15 = vadd.f32 %v548_v14, %v446_v12  ;;  %v573_v17 = vadd.f32 %v544_v16, %v445_v51 }
  0xf5   : > { %v590_v19 = vmax.f32 %v574_v15, 0.0  ;;  %v589_v21 = vmax.f32 %v573_v17, 0.0 }
  0xf7   : > { %607 = vst.msk [vmem:[%s1218_s20 + $0x60] sm:$0xff] %vm594_vm0, %v590_v19 }
  0xf8   : > { %606 = vst.msk [vmem:[%s1218_s20 + $0x58] sm:$0xff] %vm594_vm0, %v589_v21 }
  0xfa   : > { %v560_v20 = vpop.permute.xlu1 %559  ;;  %v556_v22 = vpop.permute.xlu0 %555 }
  0xfb   : > { %v577_v55 = vadd.f32 %v560_v20, %v449_v52  ;;  %v576_v23 = vadd.f32 %v556_v22, %v1210_v58 }
  0xfd   : > { %v593_v24 = vmax.f32 %v577_v55, 0.0  ;;  %v592_v25 = vmax.f32 %v576_v23, 0.0 }
  0xff   : > { %610 = vst.msk [vmem:[%s1218_s20 + $0x78] sm:$0xff] %vm594_vm0, %v593_v24 }
 0x100   : > { %609 = vst.msk [vmem:[%s1218_s20 + $0x70] sm:$0xff] %vm594_vm0, %v592_v25 }
 0x101   : > { %902 = shalt.err (!%p899_p7)
}
 0x102   : > { %s972_s8 = smov 128   ;;  %s973_s20 = smov 512  }
 0x103   : > { %s974_s25 = smov 8  }
 0x104   : > { %765 = dma.vmem_to_hbm [thread:$0]  (%p1055_p8), %s626_s29, 2048, %s628_s30, %s612_s5, %s972_s8, %s973_s20, %s974_s25  }
 0x105 PF: > { %p771_p10 = scmp.ge.s32.totalorder %s969_s19, 2  ;;  %s642_s16 = sand.u32 1, %s941_s12  }
 0x106   : > { %s643_s28 = scalar_lea.sflag [#allocation4], %s642_s16 }
 0x107   : > { %p768_p11 = pnand %p771_p10, %p1059_p9 }
 0x109   : > { %p769_p12 = pneg %p768_p11 }
 0x10b   : > { %936 = dma.done.wait (%p769_p12), %s643_s28, 2048  }
 0x10c   : > { %938 = vsyncadd (%p769_p12), %s643_s28, 4294965248  ;;  %s16_s19 = sadd.s32 1, %s969_s19   ;;  %s1325_s12 = smov %s945_s13 }
 0x10d   : > { %p13_p13 = scmp.ge.s32.totalorder %s16_s19, 10   ;;  %s1326_s13 = smov %s949_s14 }
 0x10e   : > { %s1327_s14 = smov %s1067_s4  ;;  %s1328_s15 = smov %s961_s17 }
 0x10f   : > { %s1329_s16 = smov %s965_s18  ;;  %s1330_s17 = smov %s1333_s22 }
 0x110   : > { %s1331_s18 = smov %s1337_s23  ;;  %15 = sbr.rel (!%p13_p13) target bundleno = 5 (0x5), region = 113 }
 0x115   :  { %649 = vsyncpa [#allocation4], 1 }
 0x116   :  { %651 = vsyncpa [#allocation4 + $0x1], 1 }

// kernel: rot_deconv2d_forward.2
= control target key start
LH: loop header
LB: loop body
LE: loop exit
PB: predicated region body
PF: predicated region fallthrough
CT: control target
= control target key end

     0   :  { %s3059_s21 = smov 0   ;;  %s3061_s22 = smov 0   ;;  %s3606_s0 = inlined_call_operand.vmem [shape: bf16[16,16,16], index: 0, kind: input, shape index: {}]   ;;  %s3607_s1 = inlined_call_operand.vmem [shape: f32[1,640], index: 1, kind: input, shape index: {}]   ;;  %s3608_s2 = inlined_call_operand.vmem [shape: bf16[2,16,1920], index: 2, kind: input, shape index: {}, may-alias: {2,3}]   ;;  %s3609_s3 = inlined_call_operand.vmem [shape: bf16[2,16,1920], index: 3, kind: input, shape index: {}, may-alias: {2,3}]   ;;  %s3610_s4 = inlined_call_operand.vmem [shape: bf16[2,16,1280], index: 4, kind: output, shape index: {0}]   ;;  %s3611_s5 = inlined_call_operand.vmem [shape: f32[4,16,1], index: 5, kind: output, shape index: {1}]   ;;  %s3612_s6 = inlined_call_operand.vmem [shape: f32[4,16,1], index: 6, kind: output, shape index: {2}]  }
   0x1   :  { %s3063_s23 = smov 0   ;;  %s3065_s24 = smov 0  }
   0x2   :  { %s3067_s25 = smov 0   ;;  %s3069_s26 = smov 0  }
   0x3   :  { %s3071_s27 = smov 0   ;;  %s3073_s28 = smov 0  }
   0x4   :  { %s3075_s29 = smov 0  }
   0x5 LB: > { %s2581_s30 = sadd.s32 4294967295, %s3007_s29   ;;  %s26_s7 = sadd.s32 1, %s2999_s27  ;;  %s3007_s29 = sphi %s3075_s29, %s17_s29   ;;  %s3003_s28 = sphi %s3073_s28, %s3629_s28   ;;  %s2999_s27 = sphi %s3071_s27, %s3628_s27   ;;  %s2995_s26 = sphi %s3069_s26, %s3627_s26   ;;  %s2991_s25 = sphi %s3067_s25, %s3626_s25   ;;  %s2987_s24 = sphi %s3065_s24, %s3625_s24   ;;  %s2983_s23 = sphi %s3063_s23, %s3624_s23   ;;  %s2979_s22 = sphi %s3061_s22, %s3623_s22   ;;  %s2975_s21 = sphi %s3059_s21, %s3622_s21  }
   0x6   : > { %p27_p0 = scmp.ge.s32.totalorder %s26_s7, 2  ;;  %s29_s8 = sadd.s32 1, %s3003_s28 }
   0x7   : > { %s80_s9 = sadd.s32 1, %s2987_s24  ;;  %p87_p1 = scmp.ne.s32.totalorder %s2987_s24, %s2983_s23 }
   0x8   : > { %s3110_s10 = scalar_select %p27_p0, 0, %s26_s7  }
   0x9   : > { %s3631_s8 = smov (!%p27_p0, %s29_s8), %s3003_s28  ;;  %p88_p2 = scmp.eq.s32.totalorder %s3007_s29, 0 }
   0xa   : > { %3615 = sst [smem:[#allocation6_spill]] %s3110_s10  ;;  %s76_s11 = ssub.s32 %s2999_s27, %s3110_s10 }
   0xb   : > { %p31_p3 = scmp.ge.s32.totalorder %s3631_s8, 2  ;;  %s104_s12 = sadd.s32 1, %s3110_s10 }
   0xc   : > { %p3122_p4 = por %p88_p2, %p87_p1  ;;  %s106_s14 = ssub.s32 %s26_s7, %s104_s12 }
   0xd   : > { %s3633_s8 = smov (%p31_p3, %s3631_s8), 0  ;;  %s110_s15 = sadd.s32 1, %s2979_s22 }
   0xe   : > { %3617 = sst [smem:[#allocation7_spill]] %s3633_s8  ;;  %p117_p5 = scmp.ne.s32.totalorder %s2979_s22, %s2975_s21 }
   0xf   : > { %s75_s16 = ssub.s32 %s3003_s28, %s3633_s8  ;;  %p149_p6 = scmp.eq.s32.totalorder %s2581_s30, 3 }
  0x10   : > { %s77_s17 = sor.u32 %s76_s11, %s75_s16  ;;  %s107_s18 = sor.u32 %s106_s14, %s75_s16 }
  0x11   : > { %p78_p7 = scmp.eq.s32.totalorder %s77_s17, 0  ;;  %p108_p8 = scmp.eq.s32.totalorder %s107_s18, 0 }
  0x12   : > { %p3135_p9 = por %p117_p5, %p88_p2  ;;  %p3142_p10 = por %p149_p6, %p87_p1 }
  0x13   : > { %s3147_s7 = scalar_select %p78_p7, %s2987_s24, %s80_s9  }
  0x14   : > { %s3150_s12 = scalar_select %p108_p8, %s2979_s22, %s110_s15  }
  0x15   : > { %p2588_p11 = scmp.ge.s32.totalorder %s3007_s29, 4 }
  0x17   : > { %237 = sbr.rel (%p2588_p11) target bundleno = 58 (0x3a), region = 24 }
  0x1c   : > { %240 = sbr.rel (!%p3122_p4) target bundleno = 43 (0x2b), region = 28  ;;  %s242_s30 = sand.u32 (%p3122_p4), 1, %s2987_s24  }
  0x1d   : > { %s245_s11 = smul.u32 (%p3122_p4), 5, %s2999_s27 }
  0x1e   : > { %s2844_s14 = smul.u32 (%p3122_p4), 40, %s242_s30 }
  0x1f   : > { %s2845_s16 = smul.u32 (%p3122_p4), 30, %s3003_s28 }
  0x20   : > { %s244_s10 = scalar_lea.vmem (%p3122_p4), [#allocation3], %s2844_s14 }
  0x21   : > { %s247_s17 = sadd.s32 %s2845_s16, %s245_s11 }
  0x22   : > { %s2589_s18 = sshll.u32 %s247_s17, 2 }
  0x23   : > { %s249_s15 = scalar_lea.vmem %s3608_s2, %s2589_s18 }
  0x24   : > { %v264_v0 = vld [vmem:[%s249_s15] sm:$0xff]  ;;  %v266_v1 = vld [vmem:[%s249_s15 + $0x8] sm:$0xff]  ;;  %v2590_v4 = vld [vmem:[%s249_s15 + $0x10] sm:$0xf] }
  0x25   : > { %v268_v2 = vld [vmem:[%s249_s15 + $0x3c] sm:$0xff]  ;;  %265 = vst [vmem:[%s244_s10] sm:$0xff] %v264_v0  ;;  %v270_v3 = vld [vmem:[%s249_s15 + $0x44] sm:$0xff]  ;;  %v2592_v5 = vld [vmem:[%s249_s15 + $0x4c] sm:$0xf] }
  0x26   : > { %267 = vst [vmem:[%s244_s10 + $0x8] sm:$0xff] %v266_v1 }
  0x27   : > { %269 = vst [vmem:[%s244_s10 + $0x14] sm:$0xff] %v268_v2 }
  0x28   : > { %271 = vst [vmem:[%s244_s10 + $0x1c] sm:$0xff] %v270_v3 }
  0x29   : > { %2591 = vst [vmem:[%s244_s10 + $0x10] sm:$0xf] %v2590_v4 }
  0x2a   : > { %2593 = vst [vmem:[%s244_s10 + $0x24] sm:$0xf] %v2592_v5 }
  0x2b PF: > { %289 = sbr.rel (!%p3135_p9) target bundleno = 58 (0x3a), region = 54  ;;  %s291_s8 = sand.u32 (%p3135_p9), 1, %s2979_s22  }
  0x2c   : > { %s2459_s13 = smul.u32 (%p3135_p9), 5, %s2999_s27 }
  0x2d   : > { %s2846_s30 = smul.u32 (%p3135_p9), 40, %s291_s8 }
  0x2e   : > { %s2460_s11 = smul.u32 (%p3135_p9), 30, %s3003_s28 }
  0x2f   : > { %s293_s10 = scalar_lea.vmem (%p3135_p9), [#allocation4], %s2846_s30 }
  0x30   : > { %s2461_s14 = sadd.s32 %s2460_s11, %s2459_s13 }
  0x31   : > { %s2594_s16 = sshll.u32 %s2461_s14, 2 }
  0x32   : > { %s2463_s9 = scalar_lea.vmem %s3609_s3, %s2594_s16 }
  0x33   : > { %v2595_v6 = vld [vmem:[%s2463_s9 + $0x14] sm:$0xff]  ;;  %v2596_v7 = vld [vmem:[%s2463_s9 + $0x1c] sm:$0xff]  ;;  %v2599_v10 = vld [vmem:[%s2463_s9 + $0x24] sm:$0xf] }
  0x34   : > { %v2597_v8 = vld [vmem:[%s2463_s9 + $0x50] sm:$0xff]  ;;  %315 = vst [vmem:[%s293_s10] sm:$0xff] %v2595_v6  ;;  %v2598_v9 = vld [vmem:[%s2463_s9 + $0x58] sm:$0xff]  ;;  %v2601_v11 = vld [vmem:[%s2463_s9 + $0x60] sm:$0xf] }
  0x35   : > { %317 = vst [vmem:[%s293_s10 + $0x8] sm:$0xff] %v2596_v7 }
  0x36   : > { %319 = vst [vmem:[%s293_s10 + $0x14] sm:$0xff] %v2597_v8 }
  0x37   : > { %321 = vst [vmem:[%s293_s10 + $0x1c] sm:$0xff] %v2598_v9 }
  0x38   : > { %2600 = vst [vmem:[%s293_s10 + $0x10] sm:$0xf] %v2599_v10 }
  0x39   : > { %2602 = vst [vmem:[%s293_s10 + $0x24] sm:$0xf] %v2601_v11 }
  0x3a PF: > { %p2603_p12 = scmp.ge.s32.totalorder %s3007_s29, 1  ;;  %p338_p13 = scmp.lt.s32.totalorder %s3007_s29, 5 }
  0x3c   : > { %p339_p0 = pnand %p2603_p12, %p338_p13 }
  0x3d   : > { %s345_s19 = sand.u32 (!%p339_p0), 1, %s2983_s23   ;;  %s352_s8 = sand.u32 (!%p339_p0), 1, %s2975_s21  }
  0x3e   : > { %342 = sbr.rel (%p339_p0) target bundleno = 778 (0x30a), region = 80  ;;  %s3009_s21 = smov (!%p339_p0), 127  }
  0x3f   : > { %s3172_s15 = smul.u32 (!%p339_p0), 40, %s345_s19  ;;  %s3010_s23 = smov (!%p339_p0), 126  }
  0x40   : > { %s2848_s13 = smul.u32 (!%p339_p0), 40, %s352_s8  ;;  %s3011_s14 = smov (!%p339_p0), 125  }
  0x41   : > { %s347_s30 = scalar_lea.vmem (!%p339_p0), [#allocation3], %s3172_s15  ;;  %s3012_s16 = smov (!%p339_p0), 88  }
  0x42   : > { %s354_s11 = scalar_lea.vmem (!%p339_p0), [#allocation4], %s2848_s13  ;;  %s3013_s17 = smov (!%p339_p0), 87  }
  0x43   : > { %v422_v12 = vld [vmem:[%s347_s30 + $0x8] sm:$0xff]  ;;  %v425_v13 = vld [vmem:[%s347_s30 + $0x1c] sm:$0xff]  ;;  %v424_v15 = vld [vmem:[%s347_s30 + $0x14] sm:$0xff]  ;;  %s3014_s18 = smov 86   ;;  %s3015_s9 = smov 85   ;;  %vm499_vm0 = vcmask 1039360  }
  0x44   : > { %v421_v14 = vld [vmem:[%s347_s30] sm:$0xff]  ;;  %428 = vst [vmem:[#allocation2 + $0x8] sm:$0xff] %v422_v12  ;;  %v423_v16 = vld [vmem:[%s347_s30 + $0x10] sm:$0xf]  ;;  %s3016_s10 = smov 48   ;;  %vm510_vm1 = vcmask 130048  }
  0x45   : > { %431 = vst [vmem:[#allocation2 + $0x30] sm:$0xff] %v425_v13  ;;  %v426_v17 = vld [vmem:[%s347_s30 + $0x24] sm:$0xf]  ;;  %v433_v18 = vld [vmem:[%s354_s11] sm:$0xff]  ;;  %vm692_vm2 = vcmask 1031168   ;;  %s3017_s13 = smov 47  }
  0x46   : > { %427 = vst [vmem:[#allocation2] sm:$0xff] %v421_v14  ;;  %v436_v19 = vld [vmem:[%s354_s11 + $0x14] sm:$0xff]  ;;  %v2829_v45 = vld [vmem:[%s3606_s0 + $0x8] sm:$0xff]  ;;  %vm806_vm3 = vcmask 1022976   ;;  %vm920_vm4 = vcmask 719872   ;;  %vm1034_vm5 = vcmask 711680  }
  0x47   : > { %430 = vst [vmem:[#allocation2 + $0x28] sm:$0xff] %v424_v15  ;;  %v2826_v60 = vld [vmem:[%s3606_s0] sm:$0xff]  ;;  %v2830_v6 = vld [vmem:[%s3606_s0 + $0x10] sm:$0xff]  ;;  %vm1148_vm6 = vcmask 703488   ;;  %vm1262_vm7 = vcmask 695296   ;;  %vm1376_vm8 = vcmask 392192  }
  0x48   : > { %429 = vst [vmem:[#allocation2 + $0x10] sm:$0xf] %v423_v16  ;;  %vm1490_vm9 = vcmask 384000   ;;  %vm1604_vm10 = vcmask 375808   ;;  %vm1718_vm11 = vcmask 367616   ;;  %vm1832_vm12 = vcmask 64512  }
  0x49   : > { %432 = vst [vmem:[#allocation2 + $0x38] sm:$0xf] %v426_v17  ;;  %v2831_v17 = vld [vmem:[%s3606_s0 + $0x18] sm:$0xff]  ;;  %vm1946_vm13 = vcmask 56320   ;;  %vm2060_vm14 = vcmask 48128   ;;  %vm2174_vm15 = vcmask 39936  }
  0x4a   : > { %439 = vst [vmem:[#allocation2 + $0x14] sm:$0xff] %v433_v18 }
  0x4b   : > { %v2626_v20 = vld [vmem:[#allocation2 + $0x8] sm:$0xf]  ;;  %442 = vst [vmem:[#allocation2 + $0x3c] sm:$0xff] %v436_v19  ;;  %v2822_v27 = vld [vmem:[#allocation2 + $0xc] sm:$0xf] }
  0x4c   : > { %v2824_v21 = vld [vmem:[#allocation2 + $0x2c] sm:$0xf0]  ;;  %v2628_v28 = vld [vmem:[#allocation2 + $0x30] sm:$0xf0] }
  0x4d   : > { %v3176_v22 = vor.u32 %v2824_v21, %v2626_v20  ;;  %v2618_v23 = vld [vmem:[#allocation2] sm:$0xf]  ;;  %v2821_v31 = vld [vmem:[#allocation2 + $0x4] sm:$0xf]  ;;  %v3184_v33 = vor.u32 %v2822_v27, %v2628_v28 }
  0x4e   : > { %v2823_v24 = vld [vmem:[#allocation2 + $0x24] sm:$0xf0]  ;;  %v2620_v32 = vld [vmem:[#allocation2 + $0x28] sm:$0xf0] }
  0x4f   : > { %491 = vrot.lane.b32.xlu0 %v3176_v22, %s3009_s21  ;;  %v3179_v25 = vor.u32 %v2823_v24, %v2618_v23  ;;  %v2634_v26 = vld [vmem:[#allocation2 + $0x10] sm:$0xf]  ;;  %v3187_v36 = vor.u32 %v2821_v31, %v2620_v32 }
  0x50   : > { %v2828_v29 = vld [vmem:[#allocation2 + $0x34] sm:$0xf0]  ;;  %v2651_v46 = vld [vmem:[#allocation2 + $0x10] sm:$0xf] }
  0x51   : > { %487 = vrot.lane.b32.xlu1 %v3179_v25, %s3009_s21  ;;  %v3182_v30 = vor.u32 %v2828_v29, %v2634_v26  ;;  %v2827_v34 = vld [vmem:[#allocation2 + $0x14] sm:$0xf]  ;;  %v2825_v47 = vld [vmem:[#allocation2 + $0x34] sm:$0xf0] }
  0x52   : > { %v2636_v35 = vld [vmem:[#allocation2 + $0x38] sm:$0xf0]  ;;  %v2652_v52 = vor.u32 %v2825_v47, %v2651_v46 }
  0x53   : > { %495 = vrot.lane.b32.xlu2 %v3182_v30, %s3009_s21  ;;  %v3190_v37 = vor.u32 %v2827_v34, %v2636_v35 }
  0x57   : > { %493 = vrot.lane.b32.xlu0 %v3184_v33, %s3009_s21 }
  0x59   : > { %489 = vrot.lane.b32.xlu1 %v3187_v36, %s3009_s21 }
  0x5b   : > { %497 = vrot.lane.b32.xlu2 %v3190_v37, %s3009_s21  ;;  %s3018_s21 = smov 46  }
  0x5f   : > { %680 = vrot.lane.b32.xlu0 %v3179_v25, %s3010_s23 }
  0x61   : > { %682 = vrot.lane.b32.xlu1 %v3187_v36, %s3010_s23 }
  0x63   : > { %684 = vrot.lane.b32.xlu2 %v3176_v22, %s3010_s23 }
  0x67   : > { %688 = vrot.lane.b32.xlu0 %v3182_v30, %s3010_s23 }
  0x69   : > { %690 = vrot.lane.b32.xlu1 %v3190_v37, %s3010_s23 }
  0x6b   : > { %686 = vrot.lane.b32.xlu2 %v3184_v33, %s3010_s23 }
  0x6f   : > { %794 = vrot.lane.b32.xlu0 %v3179_v25, %s3011_s14 }
  0x71   : > { %796 = vrot.lane.b32.xlu1 %v3187_v36, %s3011_s14 }
  0x73   : > { %800 = vrot.lane.b32.xlu2 %v3184_v33, %s3011_s14 }
  0x77   : > { %802 = vrot.lane.b32.xlu0 %v3182_v30, %s3011_s14 }
  0x79   : > { %798 = vrot.lane.b32.xlu1 %v3176_v22, %s3011_s14 }
  0x7b   : > { %804 = vrot.lane.b32.xlu2 %v3190_v37, %s3011_s14 }
  0x7f   : > { %912 = vrot.lane.b32.xlu0 %v3176_v22, %s3012_s16 }
  0x81   : > { %914 = vrot.lane.b32.xlu1 %v3184_v33, %s3012_s16 }
  0x83   : > { %908 = vrot.lane.b32.xlu2 %v3179_v25, %s3012_s16 }
  0x87   : > { %910 = vrot.lane.b32.xlu0 %v3187_v36, %s3012_s16 }
  0x89   : > { %916 = vrot.lane.b32.xlu1 %v3182_v30, %s3012_s16 }
  0x8b   : > { %1024 = vrot.lane.b32.xlu2 %v3187_v36, %s3013_s17 }
  0x8f   : > { %1026 = vrot.lane.b32.xlu0 %v3176_v22, %s3013_s17 }
  0x91   : > { %918 = vrot.lane.b32.xlu1 %v3190_v37, %s3012_s16  ;;  %s3019_s16 = smov 45  }
  0x93   : > { %1028 = vrot.lane.b32.xlu2 %v3184_v33, %s3013_s17 }
  0x97   : > { %1022 = vrot.lane.b32.xlu0 %v3179_v25, %s3013_s17 }
  0x99   : > { %1136 = vrot.lane.b32.xlu1 %v3179_v25, %s3014_s18 }
  0x9b   : > { %1138 = vrot.lane.b32.xlu2 %v3187_v36, %s3014_s18 }
  0x9f   : > { %1030 = vrot.lane.b32.xlu0 %v3182_v30, %s3013_s17 }
  0xa1   : > { %1140 = vrot.lane.b32.xlu1 %v3176_v22, %s3014_s18 }
  0xa3   : > { %1032 = vrot.lane.b32.xlu2 %v3190_v37, %s3013_s17 }
  0xa7   : > { %1144 = vrot.lane.b32.xlu0 %v3182_v30, %s3014_s18 }
  0xa9   : > { %1146 = vrot.lane.b32.xlu1 %v3190_v37, %s3014_s18 }
  0xab   : > { %1142 = vrot.lane.b32.xlu2 %v3184_v33, %s3014_s18 }
  0xad   : > { %v496_v38 = vpop.permute.xlu2 %495 }
  0xaf   : > { %1250 = vrot.lane.b32.xlu0 %v3179_v25, %s3015_s9 }
  0xb1   : > { %1252 = vrot.lane.b32.xlu1 %v3187_v36, %s3015_s9 }
  0xb3   : > { %1256 = vrot.lane.b32.xlu2 %v3184_v33, %s3015_s9 }
  0xb5   : > { %v498_v41 = vpop.permute.xlu2 %497 }
  0xb6   : > { %v504_v49 = vsel %vm499_vm0, %v496_v38, %v498_v41  ;;  %v2832_v41 = vld [vmem:[%s3606_s0 + $0x20] sm:$0xff] }
  0xb7   : > { %1258 = vrot.lane.b32.xlu0 %v3182_v30, %s3015_s9 }
  0xb9   : > { %1254 = vrot.lane.b32.xlu1 %v3176_v22, %s3015_s9 }
  0xbb   : > { %1260 = vrot.lane.b32.xlu2 %v3190_v37, %s3015_s9  ;;  %s3020_s9 = smov 8  }
  0xbd   : > { %v685_v53 = vpop.permute.xlu2 %684 }
  0xbf   : > { %1368 = vrot.lane.b32.xlu0 %v3176_v22, %s3016_s10 }
  0xc1   : > { %v492_v39 = vpop.permute.xlu0 %491  ;;  %1370 = vrot.lane.b32.xlu1 %v3184_v33, %s3016_s10 }
  0xc3   : > { %v488_v40 = vpop.permute.xlu1 %487  ;;  %1364 = vrot.lane.b32.xlu2 %v3179_v25, %s3016_s10 }
  0xc5   : > { %v687_v59 = vpop.permute.xlu2 %686 }
  0xc6   : > { %v695_v63 = vsel %vm692_vm2, %v685_v53, %v687_v59 }
  0xc7   : > { %1366 = vrot.lane.b32.xlu0 %v3187_v36, %s3016_s10 }
  0xc9   : > { %v494_v42 = vpop.permute.xlu0 %493  ;;  %1372 = vrot.lane.b32.xlu1 %v3182_v30, %s3016_s10 }
  0xca   : > { %v502_v43 = vsel %vm499_vm0, %v492_v39, %v494_v42  ;;  %v503_v44 = vsel %vm499_vm0, %v494_v42, %v496_v38 }
  0xcb   : > { %v490_v48 = vpop.permute.xlu1 %489  ;;  %549 = vmatpush.bf16.msra.mxu2 %v502_v43  ;;  %563 = vmatpush.bf16.msra.mxu3 %v503_v44 }
  0xcc   : > { %v500_v50 = vsel %vm499_vm0, %v488_v40, %v490_v48  ;;  %v501_v51 = vsel %vm499_vm0, %v490_v48, %v492_v39  ;;  %1480 = vrot.lane.b32.xlu2 %v3187_v36, %s3017_s13  ;;  %vm2340_vm0 = vcmask 7168  }
  0xcd   : > { %521 = vmatpush.bf16.msra.mxu0 %v500_v50  ;;  %535 = vmatpush.bf16.msra.mxu1 %v501_v51  ;;  %v801_v2 = vpop.permute.xlu2 %800  ;;  %v2833_v51 = vld [vmem:[%s3606_s0 + $0x28] sm:$0xff] }
  0xce   : > { %2642 = vmatmul.msk.bf16.vlgmr.msra.gmra.mxu2 %vm510_vm1, %v2829_v45  ;;  %2643 = vmatmul.msk.bf16.vlgmr.msra.gmra.mxu3 %vm510_vm1, %v2829_v45 }
  0xcf   : > { %623 = vmatpush.bf16.msrb.mxu2 %v3187_v36  ;;  %637 = vmatpush.bf16.msrb.mxu3 %v3176_v22 }
  0xd0   : > { %2640 = vmatmul.msk.bf16.vlgmr.msra.gmra.mxu0 %vm510_vm1, %v2829_v45  ;;  %2641 = vmatmul.msk.bf16.vlgmr.msra.gmra.mxu1 %vm510_vm1, %v2829_v45 }
  0xd1   : > { %577 = vmatpush.bf16.msrb.mxu0 %v504_v49  ;;  %609 = vmatpush.bf16.msrb.mxu1 %v3179_v25  ;;  %v681_v54 = vpop.permute.xlu0 %680 }
  0xd2   : > { %1482 = vrot.lane.b32.xlu0 %v3176_v22, %s3017_s13  ;;  %1374 = vrot.lane.b32.xlu1 %v3190_v37, %s3016_s10  ;;  %s3021_s10 = smov 7  }
  0xd3   : > { %v683_v55 = vpop.permute.xlu1 %682 }
  0xd4   : > { %v694_v56 = vsel %vm692_vm2, %v683_v55, %v685_v53  ;;  %v693_v57 = vsel %vm692_vm2, %v681_v54, %v683_v55  ;;  %1484 = vrot.lane.b32.xlu2 %v3184_v33, %s3017_s13 }
  0xd5   : > { %651 = vmatpush.bf16.msra.mxu0 %v3184_v33  ;;  %665 = vmatpush.bf16.msra.mxu1 %v2652_v52  ;;  %v805_v9 = vpop.permute.xlu2 %804 }
  0xd6   : > { %727 = vmatpush.bf16.msra.mxu3 %v694_v56  ;;  %713 = vmatpush.bf16.msra.mxu2 %v693_v57 }
  0xd9   : > { %v689_v58 = vpop.permute.xlu0 %688 }
  0xda   : > { %1478 = vrot.lane.b32.xlu0 %v3179_v25, %s3017_s13  ;;  %1592 = vrot.lane.b32.xlu1 %v3179_v25, %s3018_s21  ;;  %v696_v0 = vsel %vm692_vm2, %v687_v59, %v689_v58 }
  0xdb   : > { %v691_v61 = vpop.permute.xlu1 %690 }
  0xdc   : > { %v697_v62 = vsel %vm692_vm2, %v689_v58, %v691_v61  ;;  %1594 = vrot.lane.b32.xlu2 %v3187_v36, %s3018_s21  ;;  %v2834_v61 = vld [vmem:[%s3606_s0 + $0x30] sm:$0xff] }
  0xdd   : > { %v909_v15 = vpop.permute.xlu2 %908 }
  0xde   : > { %2654 = vmatmul.msk.bf16.vlgmr.msrb.gmra.mxu2 %vm510_vm1, %v2826_v60  ;;  %2655 = vmatmul.msk.bf16.vlgmr.msrb.gmra.mxu3 %vm510_vm1, %v2826_v60 }
  0xdf   : > { %769 = vmatpush.bf16.msrb.mxu2 %v697_v62 }
  0xe0   : > { %2644 = vmatmul.msk.bf16.vlgmr.msrb.gmra.mxu0 %vm510_vm1, %v2829_v45  ;;  %2653 = vmatmul.msk.bf16.vlgmr.msrb.gmra.mxu1 %vm510_vm1, %v2826_v60 }
  0xe1   : > { %741 = vmatpush.bf16.msrb.mxu0 %v695_v63  ;;  %755 = vmatpush.bf16.msrb.mxu1 %v696_v0  ;;  %v795_v1 = vpop.permute.xlu0 %794 }
  0xe2   : > { %1486 = vrot.lane.b32.xlu0 %v3182_v30, %s3017_s13  ;;  %1596 = vrot.lane.b32.xlu1 %v3176_v22, %s3018_s21 }
  0xe3   : > { %v797_v3 = vpop.permute.xlu1 %796 }
  0xe4   : > { %v807_v4 = vsel %vm806_vm3, %v795_v1, %v797_v3  ;;  %1488 = vrot.lane.b32.xlu2 %v3190_v37, %s3017_s13  ;;  %s3022_s13 = smov 6  }
  0xe5   : > { %827 = vmatpush.bf16.msrb.mxu3 %v807_v4  ;;  %v1025_v24 = vpop.permute.xlu2 %1024 }
  0xe9   : > { %v803_v5 = vpop.permute.xlu0 %802 }
  0xea   : > { %1602 = vrot.lane.b32.xlu1 %v3190_v37, %s3018_s21  ;;  %1600 = vrot.lane.b32.xlu0 %v3182_v30, %s3018_s21  ;;  %v810_v8 = vsel %vm806_vm3, %v801_v2, %v803_v5  ;;  %v811_v12 = vsel %vm806_vm3, %v803_v5, %v805_v9 }
  0xeb   : > { %v799_v7 = vpop.permute.xlu1 %798 }
  0xec   : > { %v808_v10 = vsel %vm806_vm3, %v797_v3, %v799_v7  ;;  %v809_v11 = vsel %vm806_vm3, %v799_v7, %v801_v2  ;;  %1598 = vrot.lane.b32.xlu2 %v3184_v33, %s3018_s21  ;;  %s3023_s21 = smov 5   ;;  %v2835_v2 = vld [vmem:[%s3606_s0 + $0x38] sm:$0xff] }
  0xed   : > { %v1029_v28 = vpop.permute.xlu2 %1028 }
  0xee   : > { %2664 = vmatmul.msk.bf16.vlgmr.msra.gmra.mxu2 %vm510_vm1, %v2830_v6  ;;  %2665 = vmatmul.msk.bf16.vlgmr.msra.gmra.mxu3 %vm510_vm1, %v2830_v6 }
  0xef   : > { %869 = vmatpush.bf16.msra.mxu2 %v810_v8  ;;  %883 = vmatpush.bf16.msra.mxu3 %v811_v12 }
  0xf0   : > { %2656 = vmatmul.msk.bf16.vlgmr.msra.gmra.mxu0 %vm510_vm1, %v2826_v60  ;;  %2657 = vmatmul.msk.bf16.vlgmr.msra.gmra.mxu1 %vm510_vm1, %v2826_v60 }
  0xf1   : > { %841 = vmatpush.bf16.msra.mxu0 %v808_v10  ;;  %855 = vmatpush.bf16.msra.mxu1 %v809_v11  ;;  %v913_v13 = vpop.permute.xlu0 %912 }
  0xf2   : > { %1708 = vrot.lane.b32.xlu1 %v3187_v36, %s3019_s16  ;;  %1706 = vrot.lane.b32.xlu0 %v3179_v25, %s3019_s16 }
  0xf3   : > { %v915_v14 = vpop.permute.xlu1 %914 }
  0xf4   : > { %1712 = vrot.lane.b32.xlu2 %v3184_v33, %s3019_s16  ;;  %v923_v19 = vsel %vm920_vm4, %v913_v13, %v915_v14 }
  0xf5   : > { %v1139_v39 = vpop.permute.xlu2 %1138 }
  0xf9   : > { %v911_v16 = vpop.permute.xlu0 %910 }
  0xfa   : > { %1710 = vrot.lane.b32.xlu1 %v3176_v22, %s3019_s16  ;;  %1714 = vrot.lane.b32.xlu0 %v3182_v30, %s3019_s16  ;;  %v922_v20 = vsel %vm920_vm4, %v911_v16, %v913_v13  ;;  %v921_v23 = vsel %vm920_vm4, %v909_v15, %v911_v16 }
  0xfb   : > { %v917_v18 = vpop.permute.xlu1 %916 }
  0xfc   : > { %v924_v21 = vsel %vm920_vm4, %v915_v14, %v917_v18  ;;  %1716 = vrot.lane.b32.xlu2 %v3190_v37, %s3019_s16 }
  0xfd   : > { %v1033_v45 = vpop.permute.xlu2 %1032 }
  0xfe   : > { %2668 = vmatmul.msk.bf16.vlgmr.msrb.gmra.mxu2 %vm510_vm1, %v2830_v6  ;;  %2675 = vmatmul.msk.bf16.vlgmr.msrb.gmra.mxu3 %vm510_vm1, %v2831_v17 }
  0xff   : > { %969 = vmatpush.bf16.msrb.mxu2 %v923_v19  ;;  %983 = vmatpush.bf16.msrb.mxu3 %v924_v21 }
 0x100   : > { %2666 = vmatmul.msk.bf16.vlgmr.msrb.gmra.mxu0 %vm510_vm1, %v2830_v6  ;;  %2667 = vmatmul.msk.bf16.vlgmr.msrb.gmra.mxu1 %vm510_vm1, %v2830_v6 }
 0x101   : > { %955 = vmatpush.bf16.msrb.mxu1 %v922_v20  ;;  %v1027_v26 = vpop.permute.xlu0 %1026  ;;  %941 = vmatpush.bf16.msrb.mxu0 %v921_v23 }
 0x102   : > { %1826 = vrot.lane.b32.xlu1 %v3184_v33, %s3020_s9  ;;  %1824 = vrot.lane.b32.xlu0 %v3176_v22, %s3020_s9  ;;  %v1036_v31 = vsel %vm1034_vm5, %v1025_v24, %v1027_v26  ;;  %v1037_v35 = vsel %vm1034_vm5, %v1027_v26, %v1029_v28 }
 0x103   : > { %v919_v27 = vpop.permute.xlu1 %918 }
 0x104   : > { %1820 = vrot.lane.b32.xlu2 %v3179_v25, %s3020_s9  ;;  %v925_v32 = vsel %vm920_vm4, %v917_v18, %v919_v27 }
 0x105   : > { %v1143_v50 = vpop.permute.xlu2 %1142 }
 0x109   : > { %v1023_v29 = vpop.permute.xlu0 %1022 }
 0x10a   : > { %1828 = vrot.lane.b32.xlu1 %v3182_v30, %s3020_s9  ;;  %1822 = vrot.lane.b32.xlu0 %v3187_v36, %s3020_s9  ;;  %v1035_v34 = vsel %vm1034_vm5, %v1023_v29, %v1025_v24 }
 0x10b   : > { %v1137_v38 = vpop.permute.xlu1 %1136 }
 0x10c   : > { %1936 = vrot.lane.b32.xlu2 %v3187_v36, %s3021_s10  ;;  %v1149_v43 = vsel %vm1148_vm6, %v1137_v38, %v1139_v39 }
 0x10d   : > { %v1257_v58 = vpop.permute.xlu2 %1256 }
 0x10e   : > { %2678 = vmatmul.msk.bf16.vlgmr.msra.gmra.mxu2 %vm510_vm1, %v2831_v17  ;;  %2679 = vmatmul.msk.bf16.vlgmr.msra.gmra.mxu3 %vm510_vm1, %v2831_v17 }
 0x10f   : > { %1069 = vmatpush.bf16.msra.mxu2 %v1036_v31  ;;  %1083 = vmatpush.bf16.msra.mxu3 %v1037_v35 }
 0x110   : > { %2676 = vmatmul.msk.bf16.vlgmr.msra.gmra.mxu0 %vm510_vm1, %v2831_v17  ;;  %2677 = vmatmul.msk.bf16.vlgmr.msra.gmra.mxu1 %vm510_vm1, %v2831_v17 }
 0x111   : > { %997 = vmatpush.bf16.msra.mxu0 %v925_v32  ;;  %1055 = vmatpush.bf16.msra.mxu1 %v1035_v34  ;;  %v1031_v40 = vpop.permute.xlu0 %1030 }
 0x112   : > { %1830 = vrot.lane.b32.xlu1 %v3190_v37, %s3020_s9  ;;  %1938 = vrot.lane.b32.xlu0 %v3176_v22, %s3021_s10  ;;  %v1038_v44 = vsel %vm1034_vm5, %v1029_v28, %v1031_v40  ;;  %v1039_v47 = vsel %vm1034_vm5, %v1031_v40, %v1033_v45  ;;  %s2366_s9 = smul.u32 (%p3142_p10), 5, %s2991_s25 }
 0x113   : > { %v1141_v42 = vpop.permute.xlu1 %1140 }
 0x114   : > { %1940 = vrot.lane.b32.xlu2 %v3184_v33, %s3021_s10  ;;  %v1150_v46 = vsel %vm1148_vm6, %v1139_v39, %v1141_v42  ;;  %v1151_v54 = vsel %vm1148_vm6, %v1141_v42, %v1143_v50 }
 0x119   : > { %v1145_v48 = vpop.permute.xlu0 %1144 }
 0x11a   : > { %2048 = vrot.lane.b32.xlu1 %v3179_v25, %s3022_s13  ;;  %1934 = vrot.lane.b32.xlu0 %v3179_v25, %s3021_s10  ;;  %v1152_v55 = vsel %vm1148_vm6, %v1143_v50, %v1145_v48 }
 0x11b   : > { %v1147_v49 = vpop.permute.xlu1 %1146 }
 0x11c   : > { %2050 = vrot.lane.b32.xlu2 %v3187_v36, %s3022_s13  ;;  %v1153_v53 = vsel %vm1148_vm6, %v1145_v48, %v1147_v49 }
 0x11e   : > { %2688 = vmatmul.msk.bf16.vlgmr.msrb.gmra.mxu2 %vm510_vm1, %v2832_v41  ;;  %2689 = vmatmul.msk.bf16.vlgmr.msrb.gmra.mxu3 %vm510_vm1, %v2832_v41 }
 0x11f   : > { %1169 = vmatpush.bf16.msrb.mxu2 %v1149_v43  ;;  %1183 = vmatpush.bf16.msrb.mxu3 %v1150_v46  ;;  %v2836_v46 = vld [vmem:[%s3606_s0 + $0x40] sm:$0xff] }
 0x120   : > { %2686 = vmatmul.msk.bf16.vlgmr.msrb.gmra.mxu0 %vm510_vm1, %v2832_v41  ;;  %2687 = vmatmul.msk.bf16.vlgmr.msrb.gmra.mxu1 %vm510_vm1, %v2832_v41 }
 0x121   : > { %1097 = vmatpush.bf16.msrb.mxu0 %v1038_v44  ;;  %1111 = vmatpush.bf16.msrb.mxu1 %v1039_v47  ;;  %v1251_v52 = vpop.permute.xlu0 %1250 }
 0x122   : > { %2052 = vrot.lane.b32.xlu1 %v3176_v22, %s3022_s13  ;;  %1942 = vrot.lane.b32.xlu0 %v3182_v30, %s3021_s10 }
 0x123   : > { %v1253_v56 = vpop.permute.xlu1 %1252 }
 0x124   : > { %1944 = vrot.lane.b32.xlu2 %v3190_v37, %s3021_s10  ;;  %v1263_v57 = vsel %vm1262_vm7, %v1251_v52, %v1253_v56  ;;  %s2849_s10 = smul.u32 (%p3142_p10), 20, %s2995_s26 }
 0x126   : > { %s2368_s19 = sadd.s32 (%p3142_p10), %s2849_s10, %s2366_s9 }
 0x127   : > { %s2812_s8 = sshll.u32 (%p3142_p10), %s2368_s19, 2 }
 0x129   : > { %v1259_v59 = vpop.permute.xlu0 %1258 }
 0x12a   : > { %2058 = vrot.lane.b32.xlu1 %v3190_v37, %s3022_s13  ;;  %2056 = vrot.lane.b32.xlu0 %v3182_v30, %s3022_s13  ;;  %v1266_v62 = vsel %vm1262_vm7, %v1257_v58, %v1259_v59 }
 0x12b   : > { %v1255_v60 = vpop.permute.xlu1 %1254 }
 0x12c   : > { %2054 = vrot.lane.b32.xlu2 %v3184_v33, %s3022_s13  ;;  %v1265_v0 = vsel %vm1262_vm7, %v1255_v60, %v1257_v58  ;;  %s3546_s13 = scalar_lea.vmem [#allocation5], %s3172_s15  ;;  %s2604_s15 = sshll.u32 %s2995_s26, 1 }
 0x12d   : > { %s403_s30 = sadd.s32 %s2991_s25, %s2604_s15 }
 0x12e   : > { %2698 = vmatmul.msk.bf16.vlgmr.msra.gmra.mxu2 %vm510_vm1, %v2833_v51  ;;  %2699 = vmatmul.msk.bf16.vlgmr.msra.gmra.mxu3 %vm510_vm1, %v2833_v51  ;;  %p404_p1 = scmp.lt.s32.totalorder %s403_s30, 3 }
 0x12f   : > { %1225 = vmatpush.bf16.msra.mxu2 %v1153_v53  ;;  %1283 = vmatpush.bf16.msra.mxu3 %v1263_v57 }
 0x130   : > { %2690 = vmatmul.msk.bf16.vlgmr.msra.gmra.mxu0 %vm510_vm1, %v2832_v41  ;;  %2697 = vmatmul.msk.bf16.vlgmr.msra.gmra.mxu1 %vm510_vm1, %v2833_v51  ;;  %s3635_s30 = smov (!%p404_p1, %s403_s30), 3 }
 0x131   : > { %1197 = vmatpush.bf16.msra.mxu0 %v1151_v54  ;;  %1211 = vmatpush.bf16.msra.mxu1 %v1152_v55  ;;  %v1369_v63 = vpop.permute.xlu0 %1368  ;;  %s2819_s11 = sshll.u32 %s3635_s30, 4 }
 0x132   : > { %2164 = vrot.lane.b32.xlu1 %v3187_v36, %s3023_s21  ;;  %2162 = vrot.lane.b32.xlu0 %v3179_v25, %s3023_s21  ;;  %v1261_v36 = vpop.permute.xlu2 %1260  ;;  %v1264_v25 = vsel %vm1262_vm7, %v1253_v56, %v1255_v60  ;;  %s408_s14 = scalar_lea.vmem %s3611_s5, %s2819_s11  ;;  %s417_s18 = scalar_lea.vmem %s3612_s6, %s2819_s11 }
 0x133   : > { %v1267_v1 = vsel %vm1262_vm7, %v1259_v59, %v1261_v36  ;;  %s2370_s11 = scalar_lea.vmem (%p3142_p10), %s3610_s4, %s2812_s8 }
 0x134   : > { %2168 = vrot.lane.b32.xlu2 %v3184_v33, %s3023_s21 }
 0x139   : > { %v1367_v33 = vpop.permute.xlu0 %1366 }
 0x13a   : > { %2166 = vrot.lane.b32.xlu1 %v3176_v22, %s3023_s21  ;;  %2170 = vrot.lane.b32.xlu0 %v3182_v30, %s3023_s21  ;;  %v1371_v22 = vpop.permute.xlu1 %1370  ;;  %v1365_v30 = vpop.permute.xlu2 %1364  ;;  %v1378_v7 = vsel %vm1376_vm8, %v1367_v33, %v1369_v63 }
 0x13b   : > { %v1379_v4 = vsel %vm1376_vm8, %v1369_v63, %v1371_v22 }
 0x13c   : > { %2172 = vrot.lane.b32.xlu2 %v3190_v37, %s3023_s21  ;;  %v1377_v37 = vsel %vm1376_vm8, %v1365_v30, %v1367_v33 }
 0x13e   : > { %2708 = vmatmul.msk.bf16.vlgmr.msrb.gmra.mxu2 %vm510_vm1, %v2834_v61  ;;  %2709 = vmatmul.msk.bf16.vlgmr.msrb.gmra.mxu3 %vm510_vm1, %v2834_v61 }
 0x13f   : > { %1325 = vmatpush.bf16.msrb.mxu2 %v1266_v62  ;;  %1339 = vmatpush.bf16.msrb.mxu3 %v1267_v1 }
 0x140   : > { %2700 = vmatmul.msk.bf16.vlgmr.msrb.gmra.mxu0 %vm510_vm1, %v2833_v51  ;;  %2701 = vmatmul.msk.bf16.vlgmr.msrb.gmra.mxu1 %vm510_vm1, %v2833_v51 }
 0x141   : > { %1297 = vmatpush.bf16.msrb.mxu0 %v1264_v25  ;;  %1311 = vmatpush.bf16.msrb.mxu1 %v1265_v0 }
 0x142   : > { %v1373_v3 = vpop.permute.xlu1 %1372  ;;  %v1481_v9 = vpop.permute.xlu2 %1480 }
 0x143   : > { %v1380_v8 = vsel %vm1376_vm8, %v1371_v22, %v1373_v3 }
 0x144   : > { %v1483_v11 = vpop.permute.xlu0 %1482 }
 0x145   : > { %v1492_v20 = vsel %vm1490_vm9, %v1481_v9, %v1483_v11 }
 0x14a   : > { %v1375_v15 = vpop.permute.xlu1 %1374  ;;  %v1485_v18 = vpop.permute.xlu2 %1484 }
 0x14b   : > { %v1381_v26 = vsel %vm1376_vm8, %v1373_v3, %v1375_v15  ;;  %v1493_v28 = vsel %vm1490_vm9, %v1483_v11, %v1485_v18  ;;  %v2837_v3 = vld [vmem:[%s3606_s0 + $0x48] sm:$0xff] }
 0x14c   : > { %v1479_v19 = vpop.permute.xlu0 %1478 }
 0x14d   : > { %v523_v5 = vpop.f32.mrf.mxu0  ;;  %v537_v6 = vpop.f32.mrf.mxu1  ;;  %v1491_v27 = vsel %vm1490_vm9, %v1479_v19, %v1481_v9 }
 0x14e   : > { %2712 = vmatmul.msk.bf16.vlgmr.msra.gmra.mxu2 %vm510_vm1, %v2834_v61  ;;  %2719 = vmatmul.msk.bf16.vlgmr.msra.gmra.mxu3 %vm510_vm1, %v2835_v2 }
 0x14f   : > { %1425 = vmatpush.bf16.msra.mxu2 %v1379_v4  ;;  %1439 = vmatpush.bf16.msra.mxu3 %v1380_v8 }
 0x150   : > { %2710 = vmatmul.msk.bf16.vlgmr.msra.gmra.mxu0 %vm510_vm1, %v2834_v61  ;;  %2711 = vmatmul.msk.bf16.vlgmr.msra.gmra.mxu1 %vm510_vm1, %v2834_v61 }
 0x151   : > { %v551_v10 = vpop.f32.mrf.mxu2  ;;  %1411 = vmatpush.bf16.msra.mxu1 %v1378_v7  ;;  %v565_v12 = vpop.f32.mrf.mxu3  ;;  %1397 = vmatpush.bf16.msra.mxu0 %v1377_v37 }
 0x152   : > { %v1593_v29 = vpop.permute.xlu1 %1592  ;;  %v1595_v38 = vpop.permute.xlu2 %1594 }
 0x153   : > { %v1605_v49 = vsel %vm1604_vm10, %v1593_v29, %v1595_v38 }
 0x154   : > { %v1487_v42 = vpop.permute.xlu0 %1486 }
 0x155   : > { %v525_v13 = vpop.f32.mrf.mxu0  ;;  %v539_v14 = vpop.f32.mrf.mxu1  ;;  %v1494_v54 = vsel %vm1490_vm9, %v1485_v18, %v1487_v42 }
 0x159   : > { %v553_v16 = vpop.f32.mrf.mxu2  ;;  %v567_v17 = vpop.f32.mrf.mxu3 }
 0x15a   : > { %v1597_v47 = vpop.permute.xlu1 %1596  ;;  %v1489_v55 = vpop.permute.xlu2 %1488 }
 0x15b   : > { %v1606_v56 = vsel %vm1604_vm10, %v1595_v38, %v1597_v47  ;;  %v1495_v57 = vsel %vm1490_vm9, %v1487_v42, %v1489_v55 }
 0x15c   : > { %v1601_v58 = vpop.permute.xlu0 %1600 }
 0x15d   : > { %v579_v21 = vpop.f32.mrf.mxu0  ;;  %v611_v23 = vpop.f32.mrf.mxu1 }
 0x15e   : > { %v612_v24 = vadd.f32 %v611_v23, %v523_v5  ;;  %2722 = vmatmul.msk.bf16.vlgmr.msrb.gmra.mxu2 %vm510_vm1, %v2835_v2  ;;  %2723 = vmatmul.msk.bf16.vlgmr.msrb.gmra.mxu3 %vm510_vm1, %v2835_v2 }
 0x15f   : > { %1525 = vmatpush.bf16.msrb.mxu2 %v1492_v20  ;;  %1539 = vmatpush.bf16.msrb.mxu3 %v1493_v28 }
 0x160   : > { %2720 = vmatmul.msk.bf16.vlgmr.msrb.gmra.mxu0 %vm510_vm1, %v2835_v2  ;;  %2721 = vmatmul.msk.bf16.vlgmr.msrb.gmra.mxu1 %vm510_vm1, %v2835_v2 }
 0x161   : > { %1453 = vmatpush.bf16.msrb.mxu0 %v1381_v26  ;;  %v625_v31 = vpop.f32.mrf.mxu2  ;;  %1511 = vmatpush.bf16.msrb.mxu1 %v1491_v27  ;;  %v639_v34 = vpop.f32.mrf.mxu3 }
 0x162   : > { %v626_v32 = vadd.f32 %v625_v31, %v537_v6  ;;  %v640_v35 = vadd.f32 %v639_v34, %v551_v10  ;;  %v1603_v36 = vpop.permute.xlu1 %1602  ;;  %v1599_v30 = vpop.permute.xlu2 %1598  ;;  %v2838_v31 = vld [vmem:[%s3606_s0 + $0x50] sm:$0xff] }
 0x163   : > { %v1609_v6 = vsel %vm1604_vm10, %v1601_v58, %v1603_v36  ;;  %v1607_v10 = vsel %vm1604_vm10, %v1597_v47, %v1599_v30  ;;  %v1608_v11 = vsel %vm1604_vm10, %v1599_v30, %v1601_v58 }
 0x164   : > { %v1707_v4 = vpop.permute.xlu0 %1706 }
 0x165   : > { %v581_v39 = vpop.f32.mrf.mxu0  ;;  %v613_v40 = vpop.f32.mrf.mxu1 }
 0x166   : > { %v614_v41 = vadd.f32 %v613_v40, %v525_v13 }
 0x169   : > { %v627_v43 = vpop.f32.mrf.mxu2  ;;  %v641_v45 = vpop.f32.mrf.mxu3 }
 0x16a   : > { %v628_v44 = vadd.f32 %v627_v43, %v539_v14  ;;  %v642_v48 = vadd.f32 %v641_v45, %v553_v16  ;;  %v1713_v15 = vpop.permute.xlu2 %1712 }
 0x16c   : > { %v1715_v18 = vpop.permute.xlu0 %1714 }
 0x16d   : > { %v653_v50 = vpop.f32.mrf.mxu0  ;;  %v667_v51 = vpop.f32.mrf.mxu1  ;;  %v1722_v34 = vsel %vm1718_vm11, %v1713_v15, %v1715_v18 }
 0x16e   : > { %v654_v52 = vadd.f32 %v653_v50, %v565_v12  ;;  %v668_v53 = vadd.f32 %v667_v51, %v579_v21  ;;  %2732 = vmatmul.msk.bf16.vlgmr.msra.gmra.mxu2 %vm510_vm1, %v2836_v46  ;;  %2733 = vmatmul.msk.bf16.vlgmr.msra.gmra.mxu3 %vm510_vm1, %v2836_v46  ;;  %v1709_v12 = vpop.permute.xlu1 %1708 }
 0x16f   : > { %1625 = vmatpush.bf16.msra.mxu2 %v1605_v49  ;;  %1639 = vmatpush.bf16.msra.mxu3 %v1606_v56  ;;  %v1719_v13 = vsel %vm1718_vm11, %v1707_v4, %v1709_v12 }
 0x170   : > { %2730 = vmatmul.msk.bf16.vlgmr.msra.gmra.mxu0 %vm510_vm1, %v2836_v46  ;;  %2731 = vmatmul.msk.bf16.vlgmr.msra.gmra.mxu1 %vm510_vm1, %v2836_v46 }
 0x171   : > { %1553 = vmatpush.bf16.msra.mxu0 %v1494_v54  ;;  %v715_v59 = vpop.f32.mrf.mxu2  ;;  %v729_v61 = vpop.f32.mrf.mxu3  ;;  %1567 = vmatpush.bf16.msra.mxu1 %v1495_v57 }
 0x172   : > { %v776_v60 = vadd.f32 %v715_v59, %v612_v24  ;;  %v777_v62 = vadd.f32 %v729_v61, %v626_v32  ;;  %v2839_v61 = vld [vmem:[%s3606_s0 + $0x58] sm:$0xff] }
 0x174   : > { %v1825_v38 = vpop.permute.xlu0 %1824 }
 0x175   : > { %v655_v63 = vpop.f32.mrf.mxu0  ;;  %v669_v25 = vpop.f32.mrf.mxu1 }
 0x176   : > { %v656_v0 = vadd.f32 %v655_v63, %v567_v17  ;;  %v670_v1 = vadd.f32 %v669_v25, %v581_v39  ;;  %v1711_v27 = vpop.permute.xlu1 %1710 }
 0x177   : > { %v1720_v43 = vsel %vm1718_vm11, %v1709_v12, %v1711_v27 }
 0x179   : > { %v717_v22 = vpop.f32.mrf.mxu2  ;;  %v731_v2 = vpop.f32.mrf.mxu3 }
 0x17a   : > { %v781_v33 = vadd.f32 %v717_v22, %v614_v41  ;;  %v782_v5 = vadd.f32 %v731_v2, %v628_v44  ;;  %v1721_v44 = vsel %vm1718_vm11, %v1711_v27, %v1713_v15 }
 0x17c   : > { %v1823_v56 = vpop.permute.xlu0 %1822 }
 0x17d   : > { %v743_v7 = vpop.f32.mrf.mxu0  ;;  %v757_v8 = vpop.f32.mrf.mxu1  ;;  %v1834_v22 = vsel %vm1832_vm12, %v1823_v56, %v1825_v38 }
 0x17e   : > { %v778_v37 = vadd.f32 %v743_v7, %v640_v35  ;;  %v779_v9 = vadd.f32 %v757_v8, %v654_v52  ;;  %2742 = vmatmul.msk.bf16.vlgmr.msrb.gmra.mxu2 %vm510_vm1, %v2837_v3  ;;  %2743 = vmatmul.msk.bf16.vlgmr.msrb.gmra.mxu3 %vm510_vm1, %v2837_v3  ;;  %v1717_v35 = vpop.permute.xlu2 %1716  ;;  %v1827_v47 = vpop.permute.xlu1 %1826 }
 0x17f   : > { %1681 = vmatpush.bf16.msrb.mxu2 %v1609_v6  ;;  %1739 = vmatpush.bf16.msrb.mxu3 %v1719_v13  ;;  %v1723_v45 = vsel %vm1718_vm11, %v1715_v18, %v1717_v35  ;;  %v1835_v36 = vsel %vm1832_vm12, %v1825_v38, %v1827_v47 }
 0x180   : > { %2734 = vmatmul.msk.bf16.vlgmr.msrb.gmra.mxu0 %vm510_vm1, %v2836_v46  ;;  %2741 = vmatmul.msk.bf16.vlgmr.msrb.gmra.mxu1 %vm510_vm1, %v2837_v3 }
 0x181   : > { %1653 = vmatpush.bf16.msrb.mxu0 %v1607_v10  ;;  %v771_v14 = vpop.f32.mrf.mxu2  ;;  %1667 = vmatpush.bf16.msrb.mxu1 %v1608_v11  ;;  %v829_v17 = vpop.f32.mrf.mxu3 }
 0x182   : > { %v780_v16 = vadd.f32 %v771_v14, %v668_v53  ;;  %v890_v19 = vadd.f32 %v829_v17, %v776_v60 }
 0x184   : > { %v1939_v4 = vpop.permute.xlu0 %1938 }
 0x185   : > { %v745_v20 = vpop.f32.mrf.mxu0  ;;  %v759_v21 = vpop.f32.mrf.mxu1 }
 0x186   : > { %v783_v23 = vadd.f32 %v745_v20, %v642_v48  ;;  %v784_v24 = vadd.f32 %v759_v21, %v656_v0  ;;  %v1821_v55 = vpop.permute.xlu2 %1820 }
 0x189   : > { %v773_v26 = vpop.f32.mrf.mxu2  ;;  %v831_v29 = vpop.f32.mrf.mxu3 }
 0x18a   : > { %v785_v28 = vadd.f32 %v773_v26, %v670_v1  ;;  %v895_v32 = vadd.f32 %v831_v29, %v781_v33  ;;  %v1833_v33 = vsel %vm1832_vm12, %v1821_v55, %v1823_v56 }
 0x18c   : > { %v1935_v17 = vpop.permute.xlu0 %1934 }
 0x18d   : > { %v843_v39 = vpop.f32.mrf.mxu0  ;;  %v857_v40 = vpop.f32.mrf.mxu1 }
 0x18e   : > { %v891_v41 = vadd.f32 %v843_v39, %v777_v62  ;;  %v892_v42 = vadd.f32 %v857_v40, %v778_v37  ;;  %2752 = vmatmul.msk.bf16.vlgmr.msra.gmra.mxu2 %vm510_vm1, %v2838_v31  ;;  %2753 = vmatmul.msk.bf16.vlgmr.msra.gmra.mxu3 %vm510_vm1, %v2838_v31  ;;  %v1829_v62 = vpop.permute.xlu1 %1828  ;;  %v1937_v2 = vpop.permute.xlu2 %1936 }
 0x18f   : > { %1781 = vmatpush.bf16.msra.mxu2 %v1722_v34  ;;  %1795 = vmatpush.bf16.msra.mxu3 %v1723_v45  ;;  %v1836_v30 = vsel %vm1832_vm12, %v1827_v47, %v1829_v62  ;;  %v1948_v18 = vsel %vm1946_vm13, %v1937_v2, %v1939_v4  ;;  %v1947_v26 = vsel %vm1946_vm13, %v1935_v17, %v1937_v2 }
 0x190   : > { %2744 = vmatmul.msk.bf16.vlgmr.msra.gmra.mxu0 %vm510_vm1, %v2837_v3  ;;  %2745 = vmatmul.msk.bf16.vlgmr.msra.gmra.mxu1 %vm510_vm1, %v2837_v3 }
 0x191   : > { %1753 = vmatpush.bf16.msra.mxu0 %v1720_v43  ;;  %v871_v46 = vpop.f32.mrf.mxu2  ;;  %1767 = vmatpush.bf16.msra.mxu1 %v1721_v44  ;;  %v885_v49 = vpop.f32.mrf.mxu3 }
 0x192   : > { %v893_v48 = vadd.f32 %v871_v46, %v779_v9  ;;  %v894_v50 = vadd.f32 %v885_v49, %v780_v16  ;;  %v2840_v46 = vld [vmem:[%s3606_s0 + $0x60] sm:$0xff] }
 0x194   : > { %v1943_v43 = vpop.permute.xlu0 %1942 }
 0x195   : > { %v845_v51 = vpop.f32.mrf.mxu0  ;;  %v859_v52 = vpop.f32.mrf.mxu1 }
 0x196   : > { %v896_v53 = vadd.f32 %v845_v51, %v782_v5  ;;  %v897_v54 = vadd.f32 %v859_v52, %v783_v23  ;;  %v1831_v11 = vpop.permute.xlu1 %1830  ;;  %v1941_v15 = vpop.permute.xlu2 %1940 }
 0x197   : > { %v1949_v27 = vsel %vm1946_vm13, %v1939_v4, %v1941_v15 }
 0x199   : > { %v873_v57 = vpop.f32.mrf.mxu2  ;;  %v887_v59 = vpop.f32.mrf.mxu3 }
 0x19a   : > { %v898_v58 = vadd.f32 %v873_v57, %v784_v24  ;;  %v899_v60 = vadd.f32 %v887_v59, %v785_v28  ;;  %v1837_v24 = vsel %vm1832_vm12, %v1829_v62, %v1831_v11 }
 0x19d   : > { %v943_v63 = vpop.f32.mrf.mxu0  ;;  %v957_v25 = vpop.f32.mrf.mxu1 }
 0x19e   : > { %v1004_v0 = vadd.f32 %v943_v63, %v890_v19  ;;  %v1005_v1 = vadd.f32 %v957_v25, %v891_v41  ;;  %2756 = vmatmul.msk.bf16.vlgmr.msrb.gmra.mxu2 %vm510_vm1, %v2838_v31  ;;  %2763 = vmatmul.msk.bf16.vlgmr.msrb.gmra.mxu3 %vm510_vm1, %v2839_v61  ;;  %v2049_v28 = vpop.permute.xlu1 %2048  ;;  %v2051_v35 = vpop.permute.xlu2 %2050 }
 0x19f   : > { %1881 = vmatpush.bf16.msrb.mxu2 %v1835_v36  ;;  %1895 = vmatpush.bf16.msrb.mxu3 %v1836_v30  ;;  %v2061_v49 = vsel %vm2060_vm14, %v2049_v28, %v2051_v35 }
 0x1a0   : > { %2754 = vmatmul.msk.bf16.vlgmr.msrb.gmra.mxu0 %vm510_vm1, %v2838_v31  ;;  %2755 = vmatmul.msk.bf16.vlgmr.msrb.gmra.mxu1 %vm510_vm1, %v2838_v31 }
 0x1a1   : > { %v971_v3 = vpop.f32.mrf.mxu2  ;;  %1867 = vmatpush.bf16.msrb.mxu1 %v1834_v22  ;;  %v985_v6 = vpop.f32.mrf.mxu3  ;;  %1853 = vmatpush.bf16.msrb.mxu0 %v1833_v33 }
 0x1a2   : > { %v1006_v5 = vadd.f32 %v971_v3, %v892_v42  ;;  %v1007_v7 = vadd.f32 %v985_v6, %v893_v48  ;;  %v2841_v3 = vld [vmem:[%s3606_s0 + $0x68] sm:$0xff] }
 0x1a5   : > { %v945_v8 = vpop.f32.mrf.mxu0  ;;  %v959_v37 = vpop.f32.mrf.mxu1 }
 0x1a6   : > { %v1009_v9 = vadd.f32 %v945_v8, %v895_v32  ;;  %v1010_v10 = vadd.f32 %v959_v37, %v896_v53  ;;  %v2053_v47 = vpop.permute.xlu1 %2052  ;;  %v1945_v55 = vpop.permute.xlu2 %1944 }
 0x1a7   : > { %v2062_v56 = vsel %vm2060_vm14, %v2051_v35, %v2053_v47  ;;  %v1951_v57 = vsel %vm1946_vm13, %v1943_v43, %v1945_v55 }
 0x1a9   : > { %v973_v12 = vpop.f32.mrf.mxu2  ;;  %v987_v14 = vpop.f32.mrf.mxu3 }
 0x1aa   : > { %v1011_v13 = vadd.f32 %v973_v12, %v897_v54  ;;  %v1012_v16 = vadd.f32 %v987_v14, %v898_v58  ;;  %v1950_v54 = vsel %vm1946_vm13, %v1941_v15, %v1943_v43 }
 0x1ad   : > { %v999_v19 = vpop.f32.mrf.mxu0  ;;  %v1057_v20 = vpop.f32.mrf.mxu1 }
 0x1ae   : > { %v1008_v21 = vadd.f32 %v999_v19, %v894_v50  ;;  %v1118_v23 = vadd.f32 %v1057_v20, %v1004_v0  ;;  %2766 = vmatmul.msk.bf16.vlgmr.msra.gmra.mxu2 %vm510_vm1, %v2839_v61  ;;  %2767 = vmatmul.msk.bf16.vlgmr.msra.gmra.mxu3 %vm510_vm1, %v2839_v61  ;;  %v2059_v36 = vpop.permute.xlu1 %2058  ;;  %v2055_v2 = vpop.permute.xlu2 %2054 }
 0x1af   : > { %1981 = vmatpush.bf16.msra.mxu2 %v1948_v18  ;;  %1995 = vmatpush.bf16.msra.mxu3 %v1949_v27 }
 0x1b0   : > { %2764 = vmatmul.msk.bf16.vlgmr.msra.gmra.mxu0 %vm510_vm1, %v2839_v61  ;;  %2765 = vmatmul.msk.bf16.vlgmr.msra.gmra.mxu1 %vm510_vm1, %v2839_v61  ;;  %v2057_v61 = vpop.permute.xlu0 %2056 }
 0x1b1   : > { %1909 = vmatpush.bf16.msra.mxu0 %v1837_v24  ;;  %v1071_v29 = vpop.f32.mrf.mxu2  ;;  %1967 = vmatpush.bf16.msra.mxu1 %v1947_v26  ;;  %v1085_v32 = vpop.f32.mrf.mxu3  ;;  %v2064_v11 = vsel %vm2060_vm14, %v2055_v2, %v2057_v61 }
 0x1b2   : > { %v1119_v31 = vadd.f32 %v1071_v29, %v1005_v1  ;;  %v1120_v34 = vadd.f32 %v1085_v32, %v1006_v5  ;;  %v2065_v5 = vsel %vm2060_vm14, %v2057_v61, %v2059_v36  ;;  %v2842_v29 = vld [vmem:[%s3606_s0 + $0x70] sm:$0xff] }
 0x1b5   : > { %v1001_v38 = vpop.f32.mrf.mxu0  ;;  %v1059_v39 = vpop.f32.mrf.mxu1 }
 0x1b6   : > { %v1013_v40 = vadd.f32 %v1001_v38, %v899_v60  ;;  %v1123_v41 = vadd.f32 %v1059_v39, %v1009_v9  ;;  %v2165_v12 = vpop.permute.xlu1 %2164  ;;  %v2169_v17 = vpop.permute.xlu2 %2168 }
 0x1b8   : > { %v2163_v6 = vpop.permute.xlu0 %2162 }
 0x1b9   : > { %v1073_v42 = vpop.f32.mrf.mxu2  ;;  %v1087_v45 = vpop.f32.mrf.mxu3 }
 0x1ba   : > { %v1124_v44 = vadd.f32 %v1073_v42, %v1010_v10  ;;  %v1125_v48 = vadd.f32 %v1087_v45, %v1011_v13  ;;  %v2063_v10 = vsel %vm2060_vm14, %v2053_v47, %v2055_v2  ;;  %v2175_v13 = vsel %vm2174_vm15, %v2163_v6, %v2165_v12 }
 0x1bd   : > { %v1099_v50 = vpop.f32.mrf.mxu0  ;;  %v1113_v51 = vpop.f32.mrf.mxu1 }
 0x1be   : > { %v1121_v52 = vadd.f32 %v1099_v50, %v1007_v7  ;;  %v1122_v53 = vadd.f32 %v1113_v51, %v1008_v21  ;;  %2776 = vmatmul.msk.bf16.vlgmr.msrb.gmra.mxu2 %vm510_vm1, %v2840_v46  ;;  %2777 = vmatmul.msk.bf16.vlgmr.msrb.gmra.mxu3 %vm510_vm1, %v2840_v46  ;;  %v2167_v32 = vpop.permute.xlu1 %2166  ;;  %v2173_v35 = vpop.permute.xlu2 %2172 }
 0x1bf   : > { %2081 = vmatpush.bf16.msrb.mxu2 %v2061_v49  ;;  %2095 = vmatpush.bf16.msrb.mxu3 %v2062_v56  ;;  %v2176_v42 = vsel %vm2174_vm15, %v2165_v12, %v2167_v32  ;;  %v2177_v43 = vsel %vm2174_vm15, %v2167_v32, %v2169_v17 }
 0x1c0   : > { %2774 = vmatmul.msk.bf16.vlgmr.msrb.gmra.mxu0 %vm510_vm1, %v2840_v46  ;;  %2775 = vmatmul.msk.bf16.vlgmr.msrb.gmra.mxu1 %vm510_vm1, %v2840_v46  ;;  %v2171_v26 = vpop.permute.xlu0 %2170 }
 0x1c1   : > { %2009 = vmatpush.bf16.msrb.mxu0 %v1950_v54  ;;  %v1171_v58 = vpop.f32.mrf.mxu2  ;;  %v1185_v60 = vpop.f32.mrf.mxu3  ;;  %2023 = vmatpush.bf16.msrb.mxu1 %v1951_v57  ;;  %v2843_v57 = vld [vmem:[%s3606_s0 + $0x78] sm:$0xff] }
 0x1c2   : > { %v1232_v59 = vadd.f32 %v1171_v58, %v1118_v23  ;;  %v1233_v62 = vadd.f32 %v1185_v60, %v1119_v31 }
 0x1c5   : > { %v1101_v63 = vpop.f32.mrf.mxu0  ;;  %v1115_v25 = vpop.f32.mrf.mxu1 }
 0x1c6   : > { %v1126_v0 = vadd.f32 %v1101_v63, %v1012_v16  ;;  %v1127_v1 = vadd.f32 %v1115_v25, %v1013_v40 }
 0x1c9   : > { %v1173_v22 = vpop.f32.mrf.mxu2  ;;  %v1187_v33 = vpop.f32.mrf.mxu3 }
 0x1ca   : > { %v1237_v30 = vadd.f32 %v1173_v22, %v1123_v41  ;;  %v1238_v4 = vadd.f32 %v1187_v33, %v1124_v44  ;;  %v2179_v44 = vsel %vm2174_vm15, %v2171_v26, %v2173_v35 }
 0x1cd   : > { %v1199_v7 = vpop.f32.mrf.mxu0  ;;  %v1213_v8 = vpop.f32.mrf.mxu1 }
 0x1ce   : > { %v1234_v37 = vadd.f32 %v1199_v7, %v1120_v34  ;;  %v1235_v9 = vadd.f32 %v1213_v8, %v1121_v52  ;;  %2786 = vmatmul.msk.bf16.vlgmr.msra.gmra.mxu2 %vm510_vm1, %v2841_v3  ;;  %2787 = vmatmul.msk.bf16.vlgmr.msra.gmra.mxu3 %vm510_vm1, %v2841_v3  ;;  %v2178_v34 = vsel %vm2174_vm15, %v2169_v17, %v2171_v26 }
 0x1cf   : > { %2137 = vmatpush.bf16.msra.mxu2 %v2065_v5  ;;  %2195 = vmatpush.bf16.msra.mxu3 %v2175_v13 }
 0x1d0   : > { %2778 = vmatmul.msk.bf16.vlgmr.msra.gmra.mxu0 %vm510_vm1, %v2840_v46  ;;  %2785 = vmatmul.msk.bf16.vlgmr.msra.gmra.mxu1 %vm510_vm1, %v2841_v3 }
 0x1d1   : > { %2109 = vmatpush.bf16.msra.mxu0 %v2063_v10  ;;  %v1227_v14 = vpop.f32.mrf.mxu2  ;;  %2123 = vmatpush.bf16.msra.mxu1 %v2064_v11  ;;  %v1285_v16 = vpop.f32.mrf.mxu3 }
 0x1d2   : > { %v1236_v15 = vadd.f32 %v1227_v14, %v1122_v53  ;;  %v1346_v18 = vadd.f32 %v1285_v16, %v1232_v59 }
 0x1d5   : > { %v1201_v19 = vpop.f32.mrf.mxu0  ;;  %v1215_v20 = vpop.f32.mrf.mxu1 }
 0x1d6   : > { %v1239_v21 = vadd.f32 %v1201_v19, %v1125_v48  ;;  %v1240_v23 = vadd.f32 %v1215_v20, %v1126_v0 }
 0x1d9   : > { %v1229_v24 = vpop.f32.mrf.mxu2  ;;  %v1287_v28 = vpop.f32.mrf.mxu3 }
 0x1da   : > { %v1241_v27 = vadd.f32 %v1229_v24, %v1127_v1  ;;  %v1351_v31 = vadd.f32 %v1287_v28, %v1237_v30 }
 0x1dd   : > { %v1299_v38 = vpop.f32.mrf.mxu0  ;;  %v1313_v39 = vpop.f32.mrf.mxu1 }
 0x1de   : > { %v1347_v40 = vadd.f32 %v1299_v38, %v1233_v62  ;;  %v1348_v41 = vadd.f32 %v1313_v39, %v1234_v37  ;;  %2796 = vmatmul.msk.bf16.vlgmr.msrb.gmra.mxu2 %vm510_vm1, %v2842_v29  ;;  %2797 = vmatmul.msk.bf16.vlgmr.msrb.gmra.mxu3 %vm510_vm1, %v2842_v29 }
 0x1df   : > { %2237 = vmatpush.bf16.msrb.mxu2 %v2178_v34  ;;  %2251 = vmatpush.bf16.msrb.mxu3 %v2179_v44 }
 0x1e0   : > { %2788 = vmatmul.msk.bf16.vlgmr.msrb.gmra.mxu0 %vm510_vm1, %v2841_v3  ;;  %2789 = vmatmul.msk.bf16.vlgmr.msrb.gmra.mxu1 %vm510_vm1, %v2841_v3 }
 0x1e1   : > { %2209 = vmatpush.bf16.msrb.mxu0 %v2176_v42  ;;  %v1327_v45 = vpop.f32.mrf.mxu2  ;;  %2223 = vmatpush.bf16.msrb.mxu1 %v2177_v43  ;;  %v1341_v47 = vpop.f32.mrf.mxu3 }
 0x1e2   : > { %v1349_v46 = vadd.f32 %v1327_v45, %v1235_v9  ;;  %v1350_v48 = vadd.f32 %v1341_v47, %v1236_v15 }
 0x1e5   : > { %v1301_v49 = vpop.f32.mrf.mxu0  ;;  %v1315_v50 = vpop.f32.mrf.mxu1 }
 0x1e6   : > { %v1352_v51 = vadd.f32 %v1301_v49, %v1238_v4  ;;  %v1353_v52 = vadd.f32 %v1315_v50, %v1239_v21 }
 0x1e9   : > { %v1329_v53 = vpop.f32.mrf.mxu2  ;;  %v1343_v55 = vpop.f32.mrf.mxu3 }
 0x1ea   : > { %v1354_v54 = vadd.f32 %v1329_v53, %v1240_v23  ;;  %v1355_v56 = vadd.f32 %v1343_v55, %v1241_v27 }
 0x1ed   : > { %v1399_v58 = vpop.f32.mrf.mxu0  ;;  %v1413_v59 = vpop.f32.mrf.mxu1 }
 0x1ee   : > { %v1460_v60 = vadd.f32 %v1399_v58, %v1346_v18  ;;  %v1461_v61 = vadd.f32 %v1413_v59, %v1347_v40  ;;  %2800 = vmatmul.msk.bf16.vlgmr.msra.gmra.mxu2 %vm510_vm1, %v2842_v29  ;;  %2807 = vmatmul.msk.bf16.vlgmr.msra.gmra.mxu3 %vm510_vm1, %v2843_v57 }
 0x1f0   : > { %2798 = vmatmul.msk.bf16.vlgmr.msra.gmra.mxu0 %vm510_vm1, %v2842_v29  ;;  %2799 = vmatmul.msk.bf16.vlgmr.msra.gmra.mxu1 %vm510_vm1, %v2842_v29 }
 0x1f1   : > { %v1427_v62 = vpop.f32.mrf.mxu2  ;;  %v1441_v63 = vpop.f32.mrf.mxu3 }
 0x1f2   : > { %v1462_v36 = vadd.f32 %v1427_v62, %v1348_v41  ;;  %v1463_v25 = vadd.f32 %v1441_v63, %v1349_v46 }
 0x1f5   : > { %v1401_v0 = vpop.f32.mrf.mxu0  ;;  %v1415_v1 = vpop.f32.mrf.mxu1 }
 0x1f6   : > { %v1465_v22 = vadd.f32 %v1401_v0, %v1351_v31  ;;  %v1466_v30 = vadd.f32 %v1415_v1, %v1352_v51 }
 0x1f9   : > { %v1429_v33 = vpop.f32.mrf.mxu2  ;;  %v1443_v3 = vpop.f32.mrf.mxu3 }
 0x1fa   : > { %v1467_v2 = vadd.f32 %v1429_v33, %v1353_v52  ;;  %v1468_v4 = vadd.f32 %v1443_v3, %v1354_v54 }
 0x1fd   : > { %v1455_v5 = vpop.f32.mrf.mxu0  ;;  %v1513_v6 = vpop.f32.mrf.mxu1 }
 0x1fe   : > { %v1464_v7 = vadd.f32 %v1455_v5, %v1350_v48  ;;  %v1574_v8 = vadd.f32 %v1513_v6, %v1460_v60  ;;  %2810 = vmatmul.msk.bf16.vlgmr.msrb.gmra.mxu2 %vm510_vm1, %v2843_v57  ;;  %2811 = vmatmul.msk.bf16.vlgmr.msrb.gmra.mxu3 %vm510_vm1, %v2843_v57 }
 0x200   : > { %2808 = vmatmul.msk.bf16.vlgmr.msrb.gmra.mxu0 %vm510_vm1, %v2843_v57  ;;  %2809 = vmatmul.msk.bf16.vlgmr.msrb.gmra.mxu1 %vm510_vm1, %v2843_v57 }
 0x201   : > { %v1527_v37 = vpop.f32.mrf.mxu2  ;;  %v1541_v10 = vpop.f32.mrf.mxu3 }
 0x202   : > { %v1575_v9 = vadd.f32 %v1527_v37, %v1461_v61  ;;  %v1576_v11 = vadd.f32 %v1541_v10, %v1462_v36 }
 0x205   : > { %v1457_v12 = vpop.f32.mrf.mxu0  ;;  %v1515_v13 = vpop.f32.mrf.mxu1 }
 0x206   : > { %v1469_v14 = vadd.f32 %v1457_v12, %v1355_v56  ;;  %v1579_v15 = vadd.f32 %v1515_v13, %v1465_v22 }
 0x209   : > { %v1529_v16 = vpop.f32.mrf.mxu2  ;;  %v1543_v18 = vpop.f32.mrf.mxu3 }
 0x20a   : > { %v1580_v17 = vadd.f32 %v1529_v16, %v1466_v30  ;;  %v1581_v19 = vadd.f32 %v1543_v18, %v1467_v2 }
 0x20d   : > { %v1555_v20 = vpop.f32.mrf.mxu0  ;;  %v1569_v21 = vpop.f32.mrf.mxu1 }
 0x20e   : > { %v1577_v23 = vadd.f32 %v1555_v20, %v1463_v25  ;;  %v1578_v24 = vadd.f32 %v1569_v21, %v1464_v7 }
 0x211   : > { %v1627_v26 = vpop.f32.mrf.mxu2  ;;  %v1641_v28 = vpop.f32.mrf.mxu3 }
 0x212   : > { %v1688_v27 = vadd.f32 %v1627_v26, %v1574_v8  ;;  %v1689_v29 = vadd.f32 %v1641_v28, %v1575_v9 }
 0x215   : > { %v1557_v31 = vpop.f32.mrf.mxu0  ;;  %v1571_v32 = vpop.f32.mrf.mxu1 }
 0x216   : > { %v1582_v34 = vadd.f32 %v1557_v31, %v1468_v4  ;;  %v1583_v35 = vadd.f32 %v1571_v32, %v1469_v14 }
 0x219   : > { %v1629_v38 = vpop.f32.mrf.mxu2  ;;  %v1643_v40 = vpop.f32.mrf.mxu3 }
 0x21a   : > { %v1693_v39 = vadd.f32 %v1629_v38, %v1579_v15  ;;  %v1694_v41 = vadd.f32 %v1643_v40, %v1580_v17 }
 0x21d   : > { %v1655_v42 = vpop.f32.mrf.mxu0  ;;  %v1669_v43 = vpop.f32.mrf.mxu1 }
 0x21e   : > { %v1690_v44 = vadd.f32 %v1655_v42, %v1576_v11  ;;  %v1691_v45 = vadd.f32 %v1669_v43, %v1577_v23  ;;  %v3534_v42 = vld [vmem:[%s3607_s1] sm:$0x1f] }
 0x221   : > { %v1683_v46 = vpop.f32.mrf.mxu2  ;;  %v1741_v48 = vpop.f32.mrf.mxu3 }
 0x222   : > { %v1692_v47 = vadd.f32 %v1683_v46, %v1578_v24  ;;  %v1802_v49 = vadd.f32 %v1741_v48, %v1688_v27 }
 0x225   : > { %v1657_v50 = vpop.f32.mrf.mxu0  ;;  %v1671_v51 = vpop.f32.mrf.mxu1 }
 0x226   : > { %v1695_v52 = vadd.f32 %v1657_v50, %v1581_v19  ;;  %v1696_v53 = vadd.f32 %v1671_v51, %v1582_v34 }
 0x229   : > { %v1685_v54 = vpop.f32.mrf.mxu2  ;;  %v1743_v56 = vpop.f32.mrf.mxu3 }
 0x22a   : > { %v1697_v55 = vadd.f32 %v1685_v54, %v1583_v35  ;;  %v1807_v57 = vadd.f32 %v1743_v56, %v1693_v39  ;;  %v2271_v56 = vperm.slane %v3534_v42, 1 }
 0x22d   : > { %v1755_v58 = vpop.f32.mrf.mxu0  ;;  %v1769_v59 = vpop.f32.mrf.mxu1 }
 0x22e   : > { %v1803_v60 = vadd.f32 %v1755_v58, %v1689_v29  ;;  %v1804_v61 = vadd.f32 %v1769_v59, %v1690_v44  ;;  %v2272_v58 = vperm.slane %v3534_v42, 2 }
 0x231   : > { %v1783_v62 = vpop.f32.mrf.mxu2  ;;  %v1797_v63 = vpop.f32.mrf.mxu3 }
 0x232   : > { %v1805_v36 = vadd.f32 %v1783_v62, %v1691_v45  ;;  %v1806_v25 = vadd.f32 %v1797_v63, %v1692_v47  ;;  %v2270_v47 = vperm.slane %v3534_v42, 0 }
 0x235   : > { %v1757_v0 = vpop.f32.mrf.mxu0  ;;  %v1771_v1 = vpop.f32.mrf.mxu1 }
 0x236   : > { %v1808_v22 = vadd.f32 %v1757_v0, %v1694_v41  ;;  %v1809_v30 = vadd.f32 %v1771_v1, %v1695_v52 }
 0x239   : > { %v1785_v33 = vpop.f32.mrf.mxu2  ;;  %v1799_v3 = vpop.f32.mrf.mxu3 }
 0x23a   : > { %v1810_v2 = vadd.f32 %v1785_v33, %v1696_v53  ;;  %v3521_v4 = vadd.f32 %v1799_v3, %v1697_v55 }
 0x23d   : > { %v1855_v5 = vpop.f32.mrf.mxu0  ;;  %v1869_v6 = vpop.f32.mrf.mxu1 }
 0x23e   : > { %v1916_v38 = vadd.f32 %v1855_v5, %v1802_v49  ;;  %v1917_v44 = vadd.f32 %v1869_v6, %v1803_v60 }
 0x241   : > { %v1883_v7 = vpop.f32.mrf.mxu2  ;;  %v1897_v8 = vpop.f32.mrf.mxu3 }
 0x242   : > { %v1918_v45 = vadd.f32 %v1883_v7, %v1804_v61  ;;  %v1919_v52 = vadd.f32 %v1897_v8, %v1805_v36 }
 0x245   : > { %v1857_v37 = vpop.f32.mrf.mxu0  ;;  %v1871_v9 = vpop.f32.mrf.mxu1 }
 0x246   : > { %v1921_v53 = vadd.f32 %v1857_v37, %v1807_v57  ;;  %v1922_v59 = vadd.f32 %v1871_v9, %v1808_v22 }
 0x249   : > { %v1885_v10 = vpop.f32.mrf.mxu2  ;;  %v1899_v11 = vpop.f32.mrf.mxu3 }
 0x24a   : > { %v1923_v62 = vadd.f32 %v1885_v10, %v1809_v30  ;;  %v1924_v1 = vadd.f32 %v1899_v11, %v1810_v2  ;;  %v2274_v10 = vperm.slane %v3534_v42, 4 }
 0x24d   : > { %v1911_v12 = vpop.f32.mrf.mxu0  ;;  %v1969_v13 = vpop.f32.mrf.mxu1 }
 0x24e   : > { %v2030_v39 = vadd.f32 %v1969_v13, %v1916_v38  ;;  %v1920_v60 = vadd.f32 %v1911_v12, %v1806_v25 }
 0x251   : > { %v1983_v14 = vpop.f32.mrf.mxu2  ;;  %v1997_v15 = vpop.f32.mrf.mxu3 }
 0x252   : > { %v2031_v50 = vadd.f32 %v1983_v14, %v1917_v44  ;;  %v2032_v51 = vadd.f32 %v1997_v15, %v1918_v45  ;;  %v2273_v14 = vperm.slane %v3534_v42, 3 }
 0x255   : > { %v3523_v16 = vpop.f32.mrf.mxu0  ;;  %v1971_v17 = vpop.f32.mrf.mxu1 }
 0x256   : > { %v2035_v33 = vadd.f32 %v1971_v17, %v1921_v53 }
 0x259   : > { %v1985_v18 = vpop.f32.mrf.mxu2  ;;  %v1999_v19 = vpop.f32.mrf.mxu3 }
 0x25a   : > { %v2036_v6 = vadd.f32 %v1985_v18, %v1922_v59  ;;  %v2037_v7 = vadd.f32 %v1999_v19, %v1923_v62  ;;  %v1925_v18 = vadd.f32 %v3523_v16, %v3521_v4 }
 0x25d   : > { %v2011_v20 = vpop.f32.mrf.mxu0  ;;  %v2025_v21 = vpop.f32.mrf.mxu1 }
 0x25e   : > { %v2033_v36 = vadd.f32 %v2011_v20, %v1919_v52  ;;  %v2034_v57 = vadd.f32 %v2025_v21, %v1920_v60 }
 0x261   : > { %v2083_v23 = vpop.f32.mrf.mxu2  ;;  %v2097_v24 = vpop.f32.mrf.mxu3 }
 0x262   : > { %v2144_v43 = vadd.f32 %v2083_v23, %v2030_v39  ;;  %v2145_v54 = vadd.f32 %v2097_v24, %v2031_v50 }
 0x265   : > { %v3525_v26 = vpop.f32.mrf.mxu0  ;;  %v3527_v27 = vpop.f32.mrf.mxu1 }
 0x269   : > { %v2085_v28 = vpop.f32.mrf.mxu2  ;;  %v2099_v29 = vpop.f32.mrf.mxu3 }
 0x26a   : > { %v2149_v8 = vadd.f32 %v2085_v28, %v2035_v33  ;;  %v2150_v19 = vadd.f32 %v2099_v29, %v2036_v6 }
 0x26d   : > { %v2111_v31 = vpop.f32.mrf.mxu0  ;;  %v2125_v32 = vpop.f32.mrf.mxu1 }
 0x26e   : > { %v2146_v55 = vadd.f32 %v2111_v31, %v2032_v51  ;;  %v2147_v22 = vadd.f32 %v2125_v32, %v2033_v36  ;;  %v2038_v32 = vadd.f32 %v3525_v26, %v1924_v1 }
 0x271   : > { %v2139_v34 = vpop.f32.mrf.mxu2  ;;  %v2197_v35 = vpop.f32.mrf.mxu3 }
 0x272   : > { %v2258_v46 = vadd.f32 %v2197_v35, %v2144_v43  ;;  %v2148_v30 = vadd.f32 %v2139_v34, %v2034_v57  ;;  %v2039_v34 = vadd.f32 %v3527_v27, %v1925_v18 }
 0x274   : > { %v2280_v61 = vmul.f32 %v2270_v47, %v2258_v46 }
 0x275   : > { %v2113_v40 = vpop.f32.mrf.mxu0  ;;  %v3529_v41 = vpop.f32.mrf.mxu1 }
 0x276   : > { %v2316_v25 = vmul.f32 %v2280_v61, %v2280_v61  ;;  %v2151_v23 = vadd.f32 %v2113_v40, %v2037_v7  ;;  %v2152_v50 = vadd.f32 %v3529_v41, %v2038_v32 }
 0x279   : > { %v3537_v48 = vpop.f32.mrf.mxu2  ;;  %v2199_v49 = vpop.f32.mrf.mxu3 }
 0x27a   : > { %v2263_v2 = vadd.f32 %v2199_v49, %v2149_v8  ;;  %v2153_v27 = vadd.f32 %v3537_v48, %v2039_v34 }
 0x27c   : > { %v2285_v16 = vmul.f32 %v2270_v47, %v2263_v2 }
 0x27d   : > { %v2211_v63 = vpop.f32.mrf.mxu0  ;;  %v2225_v0 = vpop.f32.mrf.mxu1 }
 0x27e   : > { %v2259_v3 = vadd.f32 %v2211_v63, %v2145_v54  ;;  %v2260_v5 = vadd.f32 %v2225_v0, %v2146_v55  ;;  %v2321_v54 = vmul.f32 %v2285_v16, %v2285_v16 }
 0x280   : > { %v2281_v37 = vmul.f32 %v2271_v56, %v2259_v3  ;;  %v2282_v13 = vmul.f32 %v2272_v58, %v2260_v5 }
 0x281   : > { %v2239_v9 = vpop.f32.mrf.mxu2  ;;  %v2253_v17 = vpop.f32.mrf.mxu3 }
 0x282   : > { %v2290_v11 = vpack.c.bf16 %v2281_v37, %v2280_v61  ;;  %v2302_v12 = vadd.f32 %v2281_v37, %v2280_v61  ;;  %v2317_v15 = vmul.f32 %v2281_v37, %v2281_v37  ;;  %v2261_v20 = vadd.f32 %v2239_v9, %v2147_v22 }
 0x283   : > { %v2262_v21 = vadd.f32 %v2253_v17, %v2148_v30  ;;  %v2318_v24 = vmul.f32 %v2282_v13, %v2282_v13 }
 0x284   : > { %2296 = vst [vmem:[%s3546_s13] sm:$0xff] %v2290_v11  ;;  %v2303_v28 = vadd.f32 %v2302_v12, %v2282_v13  ;;  %v2326_v31 = vadd.f32 %v2317_v15, %v2316_v25  ;;  %v2283_v35 = vmul.f32 %v2273_v14, %v2261_v20 }
 0x285   : > { %v2284_v38 = vmul.f32 %v2274_v10, %v2262_v21  ;;  %v2213_v39 = vpop.f32.mrf.mxu0  ;;  %v2227_v4 = vpop.f32.mrf.mxu1 }
 0x286   : > { %v2264_v29 = vadd.f32 %v2213_v39, %v2150_v19  ;;  %v2265_v42 = vadd.f32 %v2227_v4, %v2151_v23  ;;  %v2327_v40 = vadd.f32 %v2326_v31, %v2318_v24  ;;  %v2291_v43 = vpack.c.bf16 %v2283_v35, %v2282_v13 }
 0x287   : > { %v2292_v44 = vpack.c.bf16 %v2284_v38, %v2284_v38  ;;  %v2304_v45 = vadd.f32 %v2303_v28, %v2283_v35  ;;  %v2319_v46 = vmul.f32 %v2283_v35, %v2283_v35  ;;  %v2320_v53 = vmul.f32 %v2284_v38, %v2284_v38 }
 0x288   : > { %v2286_v51 = vmul.f32 %v2271_v56, %v2264_v29  ;;  %v2287_v26 = vmul.f32 %v2272_v58, %v2265_v42  ;;  %2297 = vst [vmem:[%s3546_s13 + $0x8] sm:$0xff] %v2291_v43 }
 0x289   : > { %v2241_v49 = vpop.f32.mrf.mxu2  ;;  %v2305_v52 = vadd.f32 %v2304_v45, %v2284_v38  ;;  %v2328_v47 = vadd.f32 %v2327_v40, %v2319_v46  ;;  %2298 = vst [vmem:[%s3546_s13 + $0x10] sm:$0xf] %v2292_v44  ;;  %v2255_v60 = vpop.f32.mrf.mxu3 }
 0x28a   : > { %v2293_v55 = vpack.c.bf16 %v2286_v51, %v2285_v16  ;;  %v2308_v59 = vadd.f32 %v2286_v51, %v2285_v16  ;;  %v2322_v62 = vmul.f32 %v2286_v51, %v2286_v51  ;;  %v2266_v61 = vadd.f32 %v2241_v49, %v2152_v50 }
 0x28b   : > { %v2267_v63 = vadd.f32 %v2255_v60, %v2153_v27  ;;  %2306 = vadd.xlane.f32.xlu0 %v2305_v52  ;;  %v2329_v41 = vadd.f32 %v2328_v47, %v2320_v53  ;;  %v2323_v48 = vmul.f32 %v2287_v26, %v2287_v26  ;;  %v2385_v25 = vld [vmem:[%s3546_s13] sm:$0xff] (%p3142_p10) }
 0x28c   : > { %2299 = vst [vmem:[%s3546_s13 + $0x14] sm:$0xff] %v2293_v55  ;;  %v2309_v56 = vadd.f32 %v2308_v59, %v2287_v26  ;;  %v2332_v58 = vadd.f32 %v2322_v62, %v2321_v54  ;;  %v2288_v0 = vmul.f32 %v2273_v14, %v2266_v61 }
 0x28d   : > { %v2289_v1 = vmul.f32 %v2274_v10, %v2267_v63  ;;  %2330 = vadd.xlane.f32.xlu2 %v2329_v41  ;;  %2386 = vst [vmem:[%s2370_s11] sm:$0xff] (%p3142_p10), %v2385_v25 }
 0x28e   : > { %v2333_v33 = vadd.f32 %v2332_v58, %v2323_v48  ;;  %v2294_v3 = vpack.c.bf16 %v2288_v0, %v2287_v26  ;;  %v2310_v6 = vadd.f32 %v2309_v56, %v2288_v0  ;;  %v2324_v7 = vmul.f32 %v2288_v0, %v2288_v0 }
 0x28f   : > { %v2295_v5 = vpack.c.bf16 %v2289_v1, %v2289_v1  ;;  %v2325_v57 = vmul.f32 %v2289_v1, %v2289_v1  ;;  %v2387_v9 = vld [vmem:[%s3546_s13 + $0x8] sm:$0xff] (%p3142_p10) }
 0x290   : > { %2300 = vst [vmem:[%s3546_s13 + $0x1c] sm:$0xff] %v2294_v3  ;;  %v2311_v36 = vadd.f32 %v2310_v6, %v2289_v1  ;;  %v2334_v8 = vadd.f32 %v2333_v33, %v2324_v7  ;;  %v2813_v11 = vld [vmem:[%s3546_s13 + $0x10] sm:$0xf] (%p3142_p10) }
 0x291   : > { %2301 = vst [vmem:[%s3546_s13 + $0x24] sm:$0xf] %v2295_v5 }
 0x292   : > { %2312 = vadd.xlane.f32.xlu1 %v2311_v36  ;;  %v2335_v37 = vadd.f32 %v2334_v8, %v2325_v57  ;;  %2388 = vst [vmem:[%s2370_s11 + $0x8] sm:$0xff] (%p3142_p10), %v2387_v9 }
 0x293   : > { %v2389_v10 = vld [vmem:[%s3546_s13 + $0x14] sm:$0xff] (%p3142_p10)  ;;  %2814 = vst [vmem:[%s2370_s11 + $0x10] sm:$0xf] (%p3142_p10), %v2813_v11 }
 0x294   : > { %2390 = vst [vmem:[%s2370_s11 + $0x28] sm:$0xff] (%p3142_p10), %v2389_v10 }
 0x295   : > { %2336 = vadd.xlane.f32.xlu2 %v2335_v37 }
 0x297   : > { %v2391_v2 = vld [vmem:[%s3546_s13 + $0x1c] sm:$0xff] (%p3142_p10) }
 0x298   : > { %v2815_v12 = vld [vmem:[%s3546_s13 + $0x24] sm:$0xf] (%p3142_p10)  ;;  %2392 = vst [vmem:[%s2370_s11 + $0x30] sm:$0xff] (%p3142_p10), %v2391_v2 }
 0x299   : > { %2816 = vst [vmem:[%s2370_s11 + $0x38] sm:$0xf] (%p3142_p10), %v2815_v12 }
 0x2fe   : > { %v2307_v13 = vpop.xlane.xlu0 %2306 }
 0x2ff   : > { %2341 = vst.msk [vmem:[%s408_s14] sm:$0xff] %vm2340_vm0, %v2307_v13 }
 0x300   : > { %v2331_v14 = vpop.xlane.xlu2 %2330 }
 0x301   : > { %2343 = vst.msk [vmem:[%s417_s18] sm:$0xff] %vm2340_vm0, %v2331_v14 }
 0x305   : > { %v2313_v22 = vpop.xlane.xlu1 %2312  ;;  %2365 = sbr.rel (!%p3142_p10) target bundleno = 778 (0x30a), region = 92 }
 0x306   : > { %2342 = vst.msk [vmem:[%s408_s14 + $0x8] sm:$0xff] %vm2340_vm0, %v2313_v22 }
 0x308   : > { %v2337_v30 = vpop.xlane.xlu2 %2336 }
 0x309   : > { %2344 = vst.msk [vmem:[%s417_s18 + $0x8] sm:$0xff] %vm2340_vm0, %v2337_v30 }
 0x30a PF: > { %s17_s29 = sadd.s32 1, %s3007_s29   ;;  %s3620_s20 = sld [smem:[#allocation6_spill]] }
 0x30b   : > { %p14_p2 = scmp.ge.s32.totalorder %s17_s29, 6   ;;  %s3621_s14 = sld [smem:[#allocation7_spill]] }
 0x30c   : > { %s3622_s21 = smov %s2979_s22  ;;  %s3623_s22 = smov %s3150_s12 }
 0x30d   : > { %s3624_s23 = smov %s2987_s24  ;;  %s3625_s24 = smov %s3147_s7 }
 0x30e   : > { %s3626_s25 = smov %s2999_s27  ;;  %s3627_s26 = smov %s3003_s28 }
 0x30f   :  { %16 = sbr.rel (!%p14_p2) target bundleno = 5 (0x5), region = 214 }
 0x310   : > { %s3628_s27 = smov %s3620_s20 }
 0x311   : > { %s3629_s28 = smov %s3621_s14 }

</bundles_post_ra>
